<compile_context>
chip_gen: v6e
topology: v6e:2x2x1
jax: 0.10.0
libtpu: 0.0.40
codegen_flags: <defaults>
</compile_context>

<pallas_src>
import jax
import jax.numpy as jnp
from jax.experimental import pallas as pl
from jax.experimental.pallas import tpu as pltpu

OBS_SIZE = 4
N_ACTIONS = 11
HIDDEN = 128
OUT_PAD = 128      # lane-dense padded width for the layer-3 MXU matmul
MAX_TILE_B = 512   # max batch rows per grid step (review: 512-1024 sweet spot)


def qfunction_kernel(x_ref, w1_ref, b1_ref, w2_ref, b2_ref, w3_ref, b3_ref, o_ref):
    x = x_ref[...]                                  # (tile_b, OBS_SIZE) f32
    w1 = w1_ref[...]                                # (OBS_SIZE, HIDDEN) f32

    # ---- Layer 1 on the VPU: K=4 contraction as 4 broadcast multiply-adds
    # (an MXU dot here would be ~97% padding / pure result-path latency).
    h1 = x[:, 0:1] * w1[0:1, :]
    for k in range(1, OBS_SIZE):
        h1 = h1 + x[:, k:k + 1] * w1[k:k + 1, :]
    h1 = jnp.maximum(h1 + b1_ref[...], 0.0)         # (tile_b, HIDDEN) f32

    # ---- Layer 2: 128x128 bf16 MXU matmul, f32 accumulation.
    h2 = jnp.dot(h1.astype(jnp.bfloat16), w2_ref[...],
                 preferred_element_type=jnp.float32)
    h2 = jnp.maximum(h2 + b2_ref[...], 0.0)

    # ---- Layer 3: lane-dense (zero-padded to 128) bf16 MXU matmul, then store
    # only the 11 real action lanes directly into the (tile_b, N_ACTIONS) output
    # block (no 128-wide writeback, no wrapper-side slice kernel).
    q = jnp.dot(h2.astype(jnp.bfloat16), w3_ref[...],
                preferred_element_type=jnp.float32)
    o_ref[...] = (q[:, :N_ACTIONS] + b3_ref[...]).astype(o_ref.dtype)


def _call_pallas(x_p, w1, b1, w2, b2, w3, b3, tile_b, n_tiles, b_pad,
                 core_parallel, single_buffer_weights):
    def wspec(shape):
        # Constant index_map -> weights stay VMEM-resident across batch tiles.
        if single_buffer_weights:
            return pl.BlockSpec(shape, lambda i: (0, 0), pipeline_mode=pl.Buffered(1))
        return pl.BlockSpec(shape, lambda i: (0, 0))

    sem = pltpu.CORE_PARALLEL if core_parallel else pltpu.PARALLEL
    return pl.pallas_call(
        qfunction_kernel,
        out_shape=jax.ShapeDtypeStruct((b_pad, N_ACTIONS), jnp.float32),
        grid=(n_tiles,),
        in_specs=[
            pl.BlockSpec((tile_b, OBS_SIZE), lambda i: (i, 0)),   # x tiled over batch
            wspec(w1.shape), wspec(b1.shape),
            wspec(w2.shape), wspec(b2.shape),
            wspec(w3.shape), wspec(b3.shape),
        ],
        out_specs=pl.BlockSpec((tile_b, N_ACTIONS), lambda i: (i, 0)),
        compiler_params=pltpu.CompilerParams(dimension_semantics=(sem,)),
    )(x_p, w1, b1, w2, b2, w3, b3)


# Cached (core_parallel, single_buffer_weights) config that lowered cleanly.
_WORKING_CONFIG = None


def qfunction_forward(x, w1, b1, w2, b2, w3, b3, *, max_tile_b=MAX_TILE_B):
    """x: (B, OBS_SIZE) f32. Returns Q-values (B, N_ACTIONS) f32."""
    global _WORKING_CONFIG
    B = x.shape[0]

    # Pick a batch tile: as large as possible (amortize per-step pipeline
    # overhead) but >= 2 tiles whenever the batch allows it, so a core-parallel
    # batch axis keeps both TensorCores busy on v7x.
    if B <= 16:
        tile_b = B                                  # single tile == full dims
    else:
        half = ((B + 15) // 16) * 8                 # ~B/2, rounded up to 8
        tile_b = min(max_tile_b, half)
    n_tiles = pl.cdiv(B, tile_b)
    b_pad = n_tiles * tile_b

    x_p = jnp.pad(x, ((0, b_pad - B), (0, 0))) if b_pad != B else x

    configs = []
    if _WORKING_CONFIG is not None:
        configs.append(_WORKING_CONFIG)
    for cfg in ((True, True), (True, False), (False, True), (False, False)):
        if cfg not in configs:
            configs.append(cfg)

    q_pad, last_err = None, None
    for cfg in configs:
        try:
            q_pad = jax.block_until_ready(
                _call_pallas(x_p, w1, b1, w2, b2, w3, b3,
                             tile_b, n_tiles, b_pad, *cfg))
            _WORKING_CONFIG = cfg
            break
        except Exception as e:  # fall back to a more conservative lowering
            last_err = e
            q_pad = None
    if q_pad is None:
        raise last_err

    return q_pad[:B] if b_pad != B else q_pad


def init_params(key):
    """Init mimicking PyTorch's default Linear init (uniform +-1/sqrt(fan_in)).
    Weights stored pre-transposed as (in, out); W2/W3 in bf16 (MXU inputs),
    W1 and all biases in f32.  W3 is zero-padded to OUT_PAD output lanes."""
    ks = jax.random.split(key, 6)

    def linear(kw, kb, fan_in, fan_out, w_dtype, out_pad_w=None):
        bound = 1.0 / (float(fan_in) ** 0.5)
        w = jax.random.uniform(kw, (fan_in, fan_out), jnp.float32, -bound, bound)
        b = jax.random.uniform(kb, (1, fan_out), jnp.float32, -bound, bound)
        if out_pad_w is not None and out_pad_w > fan_out:
            w = jnp.pad(w, ((0, 0), (0, out_pad_w - fan_out)))
        return w.astype(w_dtype), b

    w1, b1 = linear(ks[0], ks[1], OBS_SIZE, HIDDEN, jnp.float32)
    w2, b2 = linear(ks[2], ks[3], HIDDEN, HIDDEN, jnp.bfloat16)
    w3, b3 = linear(ks[4], ks[5], HIDDEN, N_ACTIONS, jnp.bfloat16, out_pad_w=OUT_PAD)
    return w1, b1, w2, b2, w3, b3


if __name__ == "__main__":
    key = jax.random.PRNGKey(0)
    k_params, k_x = jax.random.split(key)
    params = init_params(k_params)
    w1, b1, w2, b2, w3, b3 = params

    def reference(x):
        # Matched-precision plain-JAX reference (bf16 W2/W3, f32 accumulation).
        h1 = jnp.maximum(x @ w1 + b1, 0.0)
        h2 = jnp.maximum(
            jnp.dot(h1.astype(jnp.bfloat16), w2,
                    preferred_element_type=jnp.float32) + b2, 0.0)
        return (jnp.dot(h2.astype(jnp.bfloat16), w3,
                        preferred_element_type=jnp.float32)[:, :N_ACTIONS] + b3)

    # B=2: single full-dims tile; B=37: 2 tiles + batch padding/unpad slice;
    # B=1024: two 512-row tiles (weights DMA'd once, 2-TC sharding on v7x).
    for i, B in enumerate((2, 37, 1024)):
        x = jax.random.normal(jax.random.fold_in(k_x, i), (B, OBS_SIZE), jnp.float32)
        q = jax.block_until_ready(qfunction_forward(x, *params))
        assert q.shape == (B, N_ACTIONS), q.shape
        q_ref = reference(x)
        err = float(jnp.max(jnp.abs(q - q_ref)))
        assert jnp.allclose(q, q_ref, atol=1e-3, rtol=1e-3), \
            f"B={B}: max abs err {err}"

    print("KERNEL_OK")
</pallas_src>

<mosaic_0001>
module attributes {stable_mosaic.version = 11 : i64} {
  func.func @qfunction_kernel(%arg0: i32, %arg1: memref<2x4xf32, #tpu.memory_space<vmem>>, %arg2: memref<4x128xf32, #tpu.memory_space<vmem>>, %arg3: memref<1x128xf32, #tpu.memory_space<vmem>>, %arg4: memref<128x128xbf16, #tpu.memory_space<vmem>>, %arg5: memref<1x128xf32, #tpu.memory_space<vmem>>, %arg6: memref<128x128xbf16, #tpu.memory_space<vmem>>, %arg7: memref<1x11xf32, #tpu.memory_space<vmem>>, %arg8: memref<2x11xf32, #tpu.memory_space<vmem>>) attributes {dimension_semantics = [#tpu.dimension_semantics<core_parallel>], iteration_bounds = array<i64: 1>, scalar_prefetch = 0 : i64, scratch_operands = 0 : i64, tpu.core_type = #tpu.core_type<tc>, window_params = [{transform_indices = @transform_0, window_bounds = array<i64: 2, 4>}, {pipeline_mode = #tpu.pipeline_mode<synchronous>, transform_indices = @transform_1, window_bounds = array<i64: 4, 128>}, {pipeline_mode = #tpu.pipeline_mode<synchronous>, transform_indices = @transform_2, window_bounds = array<i64: 1, 128>}, {pipeline_mode = #tpu.pipeline_mode<synchronous>, transform_indices = @transform_3, window_bounds = array<i64: 128, 128>}, {pipeline_mode = #tpu.pipeline_mode<synchronous>, transform_indices = @transform_4, window_bounds = array<i64: 1, 128>}, {pipeline_mode = #tpu.pipeline_mode<synchronous>, transform_indices = @transform_5, window_bounds = array<i64: 128, 128>}, {pipeline_mode = #tpu.pipeline_mode<synchronous>, transform_indices = @transform_6, window_bounds = array<i64: 1, 11>}, {transform_indices = @transform_7, window_bounds = array<i64: 2, 11>}]} {
    %c0 = arith.constant 0 : index
    %c0_0 = arith.constant 0 : index
    %0 = vector.load %arg1[%c0, %c0_0] : memref<2x4xf32, #tpu.memory_space<vmem>>, vector<2x4xf32>
    %c0_1 = arith.constant 0 : index
    %c0_2 = arith.constant 0 : index
    %1 = vector.load %arg2[%c0_1, %c0_2] : memref<4x128xf32, #tpu.memory_space<vmem>>, vector<4x128xf32>
    %2 = vector.extract_strided_slice %0 {offsets = [0, 0], sizes = [2, 1], strides = [1, 1]} : vector<2x4xf32> to vector<2x1xf32>
    %3 = vector.extract_strided_slice %1 {offsets = [0, 0], sizes = [1, 128], strides = [1, 1]} : vector<4x128xf32> to vector<1x128xf32>
    %4 = vector.broadcast %2 : vector<2x1xf32> to vector<2x128xf32>
    %5 = vector.broadcast %3 : vector<1x128xf32> to vector<2x128xf32>
    %6 = arith.mulf %4, %5 : vector<2x128xf32>
    %7 = vector.extract_strided_slice %0 {offsets = [0, 1], sizes = [2, 1], strides = [1, 1]} : vector<2x4xf32> to vector<2x1xf32>
    %8 = vector.extract_strided_slice %1 {offsets = [1, 0], sizes = [1, 128], strides = [1, 1]} : vector<4x128xf32> to vector<1x128xf32>
    %9 = vector.broadcast %7 : vector<2x1xf32> to vector<2x128xf32>
    %10 = vector.broadcast %8 : vector<1x128xf32> to vector<2x128xf32>
    %11 = arith.mulf %9, %10 : vector<2x128xf32>
    %12 = arith.addf %6, %11 : vector<2x128xf32>
    %13 = vector.extract_strided_slice %0 {offsets = [0, 2], sizes = [2, 1], strides = [1, 1]} : vector<2x4xf32> to vector<2x1xf32>
    %14 = vector.extract_strided_slice %1 {offsets = [2, 0], sizes = [1, 128], strides = [1, 1]} : vector<4x128xf32> to vector<1x128xf32>
    %15 = vector.broadcast %13 : vector<2x1xf32> to vector<2x128xf32>
    %16 = vector.broadcast %14 : vector<1x128xf32> to vector<2x128xf32>
    %17 = arith.mulf %15, %16 : vector<2x128xf32>
    %18 = arith.addf %12, %17 : vector<2x128xf32>
    %19 = vector.extract_strided_slice %0 {offsets = [0, 3], sizes = [2, 1], strides = [1, 1]} : vector<2x4xf32> to vector<2x1xf32>
    %20 = vector.extract_strided_slice %1 {offsets = [3, 0], sizes = [1, 128], strides = [1, 1]} : vector<4x128xf32> to vector<1x128xf32>
    %21 = vector.broadcast %19 : vector<2x1xf32> to vector<2x128xf32>
    %22 = vector.broadcast %20 : vector<1x128xf32> to vector<2x128xf32>
    %23 = arith.mulf %21, %22 : vector<2x128xf32>
    %24 = arith.addf %18, %23 : vector<2x128xf32>
    %c0_3 = arith.constant 0 : index
    %c0_4 = arith.constant 0 : index
    %25 = vector.load %arg3[%c0_3, %c0_4] : memref<1x128xf32, #tpu.memory_space<vmem>>, vector<1x128xf32>
    %26 = vector.broadcast %25 : vector<1x128xf32> to vector<2x128xf32>
    %27 = arith.addf %24, %26 : vector<2x128xf32>
    %cst = arith.constant 0.000000e+00 : f32
    %28 = vector.broadcast %cst : f32 to vector<2x128xf32>
    %29 = arith.maximumf %27, %28 : vector<2x128xf32>
    %30 = arith.truncf %29 : vector<2x128xf32> to vector<2x128xbf16>
    %c0_5 = arith.constant 0 : index
    %c0_6 = arith.constant 0 : index
    %31 = vector.load %arg4[%c0_5, %c0_6] : memref<128x128xbf16, #tpu.memory_space<vmem>>, vector<128x128xbf16>
    %cst_7 = arith.constant dense<0.000000e+00> : vector<2x128xf32>
    %32 = tpu.matmul %30, %31, %cst_7 {dimension_numbers = #tpu.dot_dimension_numbers<[1], [0], [0], [1], [0, 0, 1, 1], [], []>} : vector<2x128xbf16>, vector<128x128xbf16>, vector<2x128xf32> -> vector<2x128xf32>
    %c0_8 = arith.constant 0 : index
    %c0_9 = arith.constant 0 : index
    %33 = vector.load %arg5[%c0_8, %c0_9] : memref<1x128xf32, #tpu.memory_space<vmem>>, vector<1x128xf32>
    %34 = vector.broadcast %33 : vector<1x128xf32> to vector<2x128xf32>
    %35 = arith.addf %32, %34 : vector<2x128xf32>
    %cst_10 = arith.constant 0.000000e+00 : f32
    %36 = vector.broadcast %cst_10 : f32 to vector<2x128xf32>
    %37 = arith.maximumf %35, %36 : vector<2x128xf32>
    %38 = arith.truncf %37 : vector<2x128xf32> to vector<2x128xbf16>
    %c0_11 = arith.constant 0 : index
    %c0_12 = arith.constant 0 : index
    %39 = vector.load %arg6[%c0_11, %c0_12] : memref<128x128xbf16, #tpu.memory_space<vmem>>, vector<128x128xbf16>
    %cst_13 = arith.constant dense<0.000000e+00> : vector<2x128xf32>
    %40 = tpu.matmul %38, %39, %cst_13 {dimension_numbers = #tpu.dot_dimension_numbers<[1], [0], [0], [1], [0, 0, 1, 1], [], []>} : vector<2x128xbf16>, vector<128x128xbf16>, vector<2x128xf32> -> vector<2x128xf32>
    %41 = vector.extract_strided_slice %40 {offsets = [0, 0], sizes = [2, 11], strides = [1, 1]} : vector<2x128xf32> to vector<2x11xf32>
    %c0_14 = arith.constant 0 : index
    %c0_15 = arith.constant 0 : index
    %42 = vector.load %arg7[%c0_14, %c0_15] : memref<1x11xf32, #tpu.memory_space<vmem>>, vector<1x11xf32>
    %43 = vector.broadcast %42 : vector<1x11xf32> to vector<2x11xf32>
    %44 = arith.addf %41, %43 : vector<2x11xf32>
    %c0_16 = arith.constant 0 : index
    %c0_17 = arith.constant 0 : index
    %45 = vector.load %arg8[%c0_16, %c0_17] : memref<2x11xf32, #tpu.memory_space<vmem>>, vector<2x11xf32>
    tpu.vector_store %arg8[%c0_16, %c0_17], %44 {strides = array<i32>} : memref<2x11xf32, #tpu.memory_space<vmem>>, vector<2x11xf32>,
    return
  }
  func.func @transform_0(%arg0: i32) -> (i32, i32) {
    %c0_i32 = arith.constant 0 : i32
    %c0_i32_0 = arith.constant 0 : i32
    return %arg0, %c0_i32 : i32, i32
  }
  func.func @transform_1(%arg0: i32) -> (i32, i32) {
    %c0_i32 = arith.constant 0 : i32
    %c0_i32_0 = arith.constant 0 : i32
    %c0_i32_1 = arith.constant 0 : i32
    return %c0_i32, %c0_i32_0 : i32, i32
  }
  func.func @transform_2(%arg0: i32) -> (i32, i32) {
    %c0_i32 = arith.constant 0 : i32
    %c0_i32_0 = arith.constant 0 : i32
    %c0_i32_1 = arith.constant 0 : i32
    return %c0_i32, %c0_i32_0 : i32, i32
  }
  func.func @transform_3(%arg0: i32) -> (i32, i32) {
    %c0_i32 = arith.constant 0 : i32
    %c0_i32_0 = arith.constant 0 : i32
    %c0_i32_1 = arith.constant 0 : i32
    return %c0_i32, %c0_i32_0 : i32, i32
  }
  func.func @transform_4(%arg0: i32) -> (i32, i32) {
    %c0_i32 = arith.constant 0 : i32
    %c0_i32_0 = arith.constant 0 : i32
    %c0_i32_1 = arith.constant 0 : i32
    return %c0_i32, %c0_i32_0 : i32, i32
  }
  func.func @transform_5(%arg0: i32) -> (i32, i32) {
    %c0_i32 = arith.constant 0 : i32
    %c0_i32_0 = arith.constant 0 : i32
    %c0_i32_1 = arith.constant 0 : i32
    return %c0_i32, %c0_i32_0 : i32, i32
  }
  func.func @transform_6(%arg0: i32) -> (i32, i32) {
    %c0_i32 = arith.constant 0 : i32
    %c0_i32_0 = arith.constant 0 : i32
    %c0_i32_1 = arith.constant 0 : i32
    return %c0_i32, %c0_i32_0 : i32, i32
  }
  func.func @transform_7(%arg0: i32) -> (i32, i32) {
    %c0_i32 = arith.constant 0 : i32
    %c0_i32_0 = arith.constant 0 : i32
    return %arg0, %c0_i32 : i32, i32
  }
}

module attributes {stable_mosaic.version = 11 : i64} {
  func.func @qfunction_kernel(%arg0: i32, %arg1: memref<2x4xf32, #tpu.memory_space<vmem>>, %arg2: memref<4x128xf32, #tpu.memory_space<vmem>>, %arg3: memref<1x128xf32, #tpu.memory_space<vmem>>, %arg4: memref<128x128xbf16, #tpu.memory_space<vmem>>, %arg5: memref<1x128xf32, #tpu.memory_space<vmem>>, %arg6: memref<128x128xbf16, #tpu.memory_space<vmem>>, %arg7: memref<1x11xf32, #tpu.memory_space<vmem>>, %arg8: memref<2x11xf32, #tpu.memory_space<vmem>>) attributes {dimension_semantics = [#tpu.dimension_semantics<core_parallel>], iteration_bounds = array<i64: 1>, scalar_prefetch = 0 : i64, scratch_operands = 0 : i64, tpu.core_type = #tpu.core_type<tc>, window_params = [{transform_indices = @transform_0, window_bounds = array<i64: 2, 4>}, {pipeline_mode = #tpu.pipeline_mode<synchronous>, transform_indices = @transform_1, window_bounds = array<i64: 4, 128>}, {pipeline_mode = #tpu.pipeline_mode<synchronous>, transform_indices = @transform_2, window_bounds = array<i64: 1, 128>}, {pipeline_mode = #tpu.pipeline_mode<synchronous>, transform_indices = @transform_3, window_bounds = array<i64: 128, 128>}, {pipeline_mode = #tpu.pipeline_mode<synchronous>, transform_indices = @transform_4, window_bounds = array<i64: 1, 128>}, {pipeline_mode = #tpu.pipeline_mode<synchronous>, transform_indices = @transform_5, window_bounds = array<i64: 128, 128>}, {pipeline_mode = #tpu.pipeline_mode<synchronous>, transform_indices = @transform_6, window_bounds = array<i64: 1, 11>}, {transform_indices = @transform_7, window_bounds = array<i64: 2, 11>}]} {
    %c0 = arith.constant 0 : index
    %c0_0 = arith.constant 0 : index
    %0 = vector.load %arg1[%c0, %c0_0] : memref<2x4xf32, #tpu.memory_space<vmem>>, vector<2x4xf32>
    %c0_1 = arith.constant 0 : index
    %c0_2 = arith.constant 0 : index
    %1 = vector.load %arg2[%c0_1, %c0_2] : memref<4x128xf32, #tpu.memory_space<vmem>>, vector<4x128xf32>
    %2 = vector.extract_strided_slice %0 {offsets = [0, 0], sizes = [2, 1], strides = [1, 1]} : vector<2x4xf32> to vector<2x1xf32>
    %3 = vector.extract_strided_slice %1 {offsets = [0, 0], sizes = [1, 128], strides = [1, 1]} : vector<4x128xf32> to vector<1x128xf32>
    %4 = vector.broadcast %2 : vector<2x1xf32> to vector<2x128xf32>
    %5 = vector.broadcast %3 : vector<1x128xf32> to vector<2x128xf32>
    %6 = arith.mulf %4, %5 : vector<2x128xf32>
    %7 = vector.extract_strided_slice %0 {offsets = [0, 1], sizes = [2, 1], strides = [1, 1]} : vector<2x4xf32> to vector<2x1xf32>
    %8 = vector.extract_strided_slice %1 {offsets = [1, 0], sizes = [1, 128], strides = [1, 1]} : vector<4x128xf32> to vector<1x128xf32>
    %9 = vector.broadcast %7 : vector<2x1xf32> to vector<2x128xf32>
    %10 = vector.broadcast %8 : vector<1x128xf32> to vector<2x128xf32>
    %11 = arith.mulf %9, %10 : vector<2x128xf32>
    %12 = arith.addf %6, %11 : vector<2x128xf32>
    %13 = vector.extract_strided_slice %0 {offsets = [0, 2], sizes = [2, 1], strides = [1, 1]} : vector<2x4xf32> to vector<2x1xf32>
    %14 = vector.extract_strided_slice %1 {offsets = [2, 0], sizes = [1, 128], strides = [1, 1]} : vector<4x128xf32> to vector<1x128xf32>
    %15 = vector.broadcast %13 : vector<2x1xf32> to vector<2x128xf32>
    %16 = vector.broadcast %14 : vector<1x128xf32> to vector<2x128xf32>
    %17 = arith.mulf %15, %16 : vector<2x128xf32>
    %18 = arith.addf %12, %17 : vector<2x128xf32>
    %19 = vector.extract_strided_slice %0 {offsets = [0, 3], sizes = [2, 1], strides = [1, 1]} : vector<2x4xf32> to vector<2x1xf32>
    %20 = vector.extract_strided_slice %1 {offsets = [3, 0], sizes = [1, 128], strides = [1, 1]} : vector<4x128xf32> to vector<1x128xf32>
    %21 = vector.broadcast %19 : vector<2x1xf32> to vector<2x128xf32>
    %22 = vector.broadcast %20 : vector<1x128xf32> to vector<2x128xf32>
    %23 = arith.mulf %21, %22 : vector<2x128xf32>
    %24 = arith.addf %18, %23 : vector<2x128xf32>
    %c0_3 = arith.constant 0 : index
    %c0_4 = arith.constant 0 : index
    %25 = vector.load %arg3[%c0_3, %c0_4] : memref<1x128xf32, #tpu.memory_space<vmem>>, vector<1x128xf32>
    %26 = vector.broadcast %25 : vector<1x128xf32> to vector<2x128xf32>
    %27 = arith.addf %24, %26 : vector<2x128xf32>
    %cst = arith.constant 0.000000e+00 : f32
    %28 = vector.broadcast %cst : f32 to vector<2x128xf32>
    %29 = arith.maximumf %27, %28 : vector<2x128xf32>
    %30 = arith.truncf %29 : vector<2x128xf32> to vector<2x128xbf16>
    %c0_5 = arith.constant 0 : index
    %c0_6 = arith.constant 0 : index
    %31 = vector.load %arg4[%c0_5, %c0_6] : memref<128x128xbf16, #tpu.memory_space<vmem>>, vector<128x128xbf16>
    %cst_7 = arith.constant dense<0.000000e+00> : vector<2x128xf32>
    %32 = tpu.matmul %30, %31, %cst_7 {dimension_numbers = #tpu.dot_dimension_numbers<[1], [0], [0], [1], [0, 0, 1, 1], [], []>} : vector<2x128xbf16>, vector<128x128xbf16>, vector<2x128xf32> -> vector<2x128xf32>
    %c0_8 = arith.constant 0 : index
    %c0_9 = arith.constant 0 : index
    %33 = vector.load %arg5[%c0_8, %c0_9] : memref<1x128xf32, #tpu.memory_space<vmem>>, vector<1x128xf32>
    %34 = vector.broadcast %33 : vector<1x128xf32> to vector<2x128xf32>
    %35 = arith.addf %32, %34 : vector<2x128xf32>
    %cst_10 = arith.constant 0.000000e+00 : f32
    %36 = vector.broadcast %cst_10 : f32 to vector<2x128xf32>
    %37 = arith.maximumf %35, %36 : vector<2x128xf32>
    %38 = arith.truncf %37 : vector<2x128xf32> to vector<2x128xbf16>
    %c0_11 = arith.constant 0 : index
    %c0_12 = arith.constant 0 : index
    %39 = vector.load %arg6[%c0_11, %c0_12] : memref<128x128xbf16, #tpu.memory_space<vmem>>, vector<128x128xbf16>
    %cst_13 = arith.constant dense<0.000000e+00> : vector<2x128xf32>
    %40 = tpu.matmul %38, %39, %cst_13 {dimension_numbers = #tpu.dot_dimension_numbers<[1], [0], [0], [1], [0, 0, 1, 1], [], []>} : vector<2x128xbf16>, vector<128x128xbf16>, vector<2x128xf32> -> vector<2x128xf32>
    %41 = vector.extract_strided_slice %40 {offsets = [0, 0], sizes = [2, 11], strides = [1, 1]} : vector<2x128xf32> to vector<2x11xf32>
    %c0_14 = arith.constant 0 : index
    %c0_15 = arith.constant 0 : index
    %42 = vector.load %arg7[%c0_14, %c0_15] : memref<1x11xf32, #tpu.memory_space<vmem>>, vector<1x11xf32>
    %43 = vector.broadcast %42 : vector<1x11xf32> to vector<2x11xf32>
    %44 = arith.addf %41, %43 : vector<2x11xf32>
    %c0_16 = arith.constant 0 : index
    %c0_17 = arith.constant 0 : index
    %45 = vector.load %arg8[%c0_16, %c0_17] : memref<2x11xf32, #tpu.memory_space<vmem>>, vector<2x11xf32>
    tpu.vector_store %arg8[%c0_16, %c0_17], %44 {strides = array<i32>} : memref<2x11xf32, #tpu.memory_space<vmem>>, vector<2x11xf32>,
    return
  }
  func.func @transform_0(%arg0: i32) -> (i32, i32) {
    %c0_i32 = arith.constant 0 : i32
    %c0_i32_0 = arith.constant 0 : i32
    return %arg0, %c0_i32 : i32, i32
  }
  func.func @transform_1(%arg0: i32) -> (i32, i32) {
    %c0_i32 = arith.constant 0 : i32
    %c0_i32_0 = arith.constant 0 : i32
    %c0_i32_1 = arith.constant 0 : i32
    return %c0_i32, %c0_i32_0 : i32, i32
  }
  func.func @transform_2(%arg0: i32) -> (i32, i32) {
    %c0_i32 = arith.constant 0 : i32
    %c0_i32_0 = arith.constant 0 : i32
    %c0_i32_1 = arith.constant 0 : i32
    return %c0_i32, %c0_i32_0 : i32, i32
  }
  func.func @transform_3(%arg0: i32) -> (i32, i32) {
    %c0_i32 = arith.constant 0 : i32
    %c0_i32_0 = arith.constant 0 : i32
    %c0_i32_1 = arith.constant 0 : i32
    return %c0_i32, %c0_i32_0 : i32, i32
  }
  func.func @transform_4(%arg0: i32) -> (i32, i32) {
    %c0_i32 = arith.constant 0 : i32
    %c0_i32_0 = arith.constant 0 : i32
    %c0_i32_1 = arith.constant 0 : i32
    return %c0_i32, %c0_i32_0 : i32, i32
  }
  func.func @transform_5(%arg0: i32) -> (i32, i32) {
    %c0_i32 = arith.constant 0 : i32
    %c0_i32_0 = arith.constant 0 : i32
    %c0_i32_1 = arith.constant 0 : i32
    return %c0_i32, %c0_i32_0 : i32, i32
  }
  func.func @transform_6(%arg0: i32) -> (i32, i32) {
    %c0_i32 = arith.constant 0 : i32
    %c0_i32_0 = arith.constant 0 : i32
    %c0_i32_1 = arith.constant 0 : i32
    return %c0_i32, %c0_i32_0 : i32, i32
  }
  func.func @transform_7(%arg0: i32) -> (i32, i32) {
    %c0_i32 = arith.constant 0 : i32
    %c0_i32_0 = arith.constant 0 : i32
    return %arg0, %c0_i32 : i32, i32
  }
}

module attributes {stable_mosaic.version = 11 : i64} {
  func.func @qfunction_kernel(%arg0: i32, %arg1: memref<2x4xf32, #tpu.memory_space<vmem>>, %arg2: memref<4x128xf32, #tpu.memory_space<vmem>>, %arg3: memref<1x128xf32, #tpu.memory_space<vmem>>, %arg4: memref<128x128xbf16, #tpu.memory_space<vmem>>, %arg5: memref<1x128xf32, #tpu.memory_space<vmem>>, %arg6: memref<128x128xbf16, #tpu.memory_space<vmem>>, %arg7: memref<1x11xf32, #tpu.memory_space<vmem>>, %arg8: memref<2x11xf32, #tpu.memory_space<vmem>>) attributes {dimension_semantics = [#tpu.dimension_semantics<parallel>], iteration_bounds = array<i64: 1>, scalar_prefetch = 0 : i64, scratch_operands = 0 : i64, tpu.core_type = #tpu.core_type<tc>, window_params = [{transform_indices = @transform_0, window_bounds = array<i64: 2, 4>}, {pipeline_mode = #tpu.pipeline_mode<synchronous>, transform_indices = @transform_1, window_bounds = array<i64: 4, 128>}, {pipeline_mode = #tpu.pipeline_mode<synchronous>, transform_indices = @transform_2, window_bounds = array<i64: 1, 128>}, {pipeline_mode = #tpu.pipeline_mode<synchronous>, transform_indices = @transform_3, window_bounds = array<i64: 128, 128>}, {pipeline_mode = #tpu.pipeline_mode<synchronous>, transform_indices = @transform_4, window_bounds = array<i64: 1, 128>}, {pipeline_mode = #tpu.pipeline_mode<synchronous>, transform_indices = @transform_5, window_bounds = array<i64: 128, 128>}, {pipeline_mode = #tpu.pipeline_mode<synchronous>, transform_indices = @transform_6, window_bounds = array<i64: 1, 11>}, {transform_indices = @transform_7, window_bounds = array<i64: 2, 11>}]} {
    %c0 = arith.constant 0 : index
    %c0_0 = arith.constant 0 : index
    %0 = vector.load %arg1[%c0, %c0_0] : memref<2x4xf32, #tpu.memory_space<vmem>>, vector<2x4xf32>
    %c0_1 = arith.constant 0 : index
    %c0_2 = arith.constant 0 : index
    %1 = vector.load %arg2[%c0_1, %c0_2] : memref<4x128xf32, #tpu.memory_space<vmem>>, vector<4x128xf32>
    %2 = vector.extract_strided_slice %0 {offsets = [0, 0], sizes = [2, 1], strides = [1, 1]} : vector<2x4xf32> to vector<2x1xf32>
    %3 = vector.extract_strided_slice %1 {offsets = [0, 0], sizes = [1, 128], strides = [1, 1]} : vector<4x128xf32> to vector<1x128xf32>
    %4 = vector.broadcast %2 : vector<2x1xf32> to vector<2x128xf32>
    %5 = vector.broadcast %3 : vector<1x128xf32> to vector<2x128xf32>
    %6 = arith.mulf %4, %5 : vector<2x128xf32>
    %7 = vector.extract_strided_slice %0 {offsets = [0, 1], sizes = [2, 1], strides = [1, 1]} : vector<2x4xf32> to vector<2x1xf32>
    %8 = vector.extract_strided_slice %1 {offsets = [1, 0], sizes = [1, 128], strides = [1, 1]} : vector<4x128xf32> to vector<1x128xf32>
    %9 = vector.broadcast %7 : vector<2x1xf32> to vector<2x128xf32>
    %10 = vector.broadcast %8 : vector<1x128xf32> to vector<2x128xf32>
    %11 = arith.mulf %9, %10 : vector<2x128xf32>
    %12 = arith.addf %6, %11 : vector<2x128xf32>
    %13 = vector.extract_strided_slice %0 {offsets = [0, 2], sizes = [2, 1], strides = [1, 1]} : vector<2x4xf32> to vector<2x1xf32>
    %14 = vector.extract_strided_slice %1 {offsets = [2, 0], sizes = [1, 128], strides = [1, 1]} : vector<4x128xf32> to vector<1x128xf32>
    %15 = vector.broadcast %13 : vector<2x1xf32> to vector<2x128xf32>
    %16 = vector.broadcast %14 : vector<1x128xf32> to vector<2x128xf32>
    %17 = arith.mulf %15, %16 : vector<2x128xf32>
    %18 = arith.addf %12, %17 : vector<2x128xf32>
    %19 = vector.extract_strided_slice %0 {offsets = [0, 3], sizes = [2, 1], strides = [1, 1]} : vector<2x4xf32> to vector<2x1xf32>
    %20 = vector.extract_strided_slice %1 {offsets = [3, 0], sizes = [1, 128], strides = [1, 1]} : vector<4x128xf32> to vector<1x128xf32>
    %21 = vector.broadcast %19 : vector<2x1xf32> to vector<2x128xf32>
    %22 = vector.broadcast %20 : vector<1x128xf32> to vector<2x128xf32>
    %23 = arith.mulf %21, %22 : vector<2x128xf32>
    %24 = arith.addf %18, %23 : vector<2x128xf32>
    %c0_3 = arith.constant 0 : index
    %c0_4 = arith.constant 0 : index
    %25 = vector.load %arg3[%c0_3, %c0_4] : memref<1x128xf32, #tpu.memory_space<vmem>>, vector<1x128xf32>
    %26 = vector.broadcast %25 : vector<1x128xf32> to vector<2x128xf32>
    %27 = arith.addf %24, %26 : vector<2x128xf32>
    %cst = arith.constant 0.000000e+00 : f32
    %28 = vector.broadcast %cst : f32 to vector<2x128xf32>
    %29 = arith.maximumf %27, %28 : vector<2x128xf32>
    %30 = arith.truncf %29 : vector<2x128xf32> to vector<2x128xbf16>
    %c0_5 = arith.constant 0 : index
    %c0_6 = arith.constant 0 : index
    %31 = vector.load %arg4[%c0_5, %c0_6] : memref<128x128xbf16, #tpu.memory_space<vmem>>, vector<128x128xbf16>
    %cst_7 = arith.constant dense<0.000000e+00> : vector<2x128xf32>
    %32 = tpu.matmul %30, %31, %cst_7 {dimension_numbers = #tpu.dot_dimension_numbers<[1], [0], [0], [1], [0, 0, 1, 1], [], []>} : vector<2x128xbf16>, vector<128x128xbf16>, vector<2x128xf32> -> vector<2x128xf32>
    %c0_8 = arith.constant 0 : index
    %c0_9 = arith.constant 0 : index
    %33 = vector.load %arg5[%c0_8, %c0_9] : memref<1x128xf32, #tpu.memory_space<vmem>>, vector<1x128xf32>
    %34 = vector.broadcast %33 : vector<1x128xf32> to vector<2x128xf32>
    %35 = arith.addf %32, %34 : vector<2x128xf32>
    %cst_10 = arith.constant 0.000000e+00 : f32
    %36 = vector.broadcast %cst_10 : f32 to vector<2x128xf32>
    %37 = arith.maximumf %35, %36 : vector<2x128xf32>
    %38 = arith.truncf %37 : vector<2x128xf32> to vector<2x128xbf16>
    %c0_11 = arith.constant 0 : index
    %c0_12 = arith.constant 0 : index
    %39 = vector.load %arg6[%c0_11, %c0_12] : memref<128x128xbf16, #tpu.memory_space<vmem>>, vector<128x128xbf16>
    %cst_13 = arith.constant dense<0.000000e+00> : vector<2x128xf32>
    %40 = tpu.matmul %38, %39, %cst_13 {dimension_numbers = #tpu.dot_dimension_numbers<[1], [0], [0], [1], [0, 0, 1, 1], [], []>} : vector<2x128xbf16>, vector<128x128xbf16>, vector<2x128xf32> -> vector<2x128xf32>
    %41 = vector.extract_strided_slice %40 {offsets = [0, 0], sizes = [2, 11], strides = [1, 1]} : vector<2x128xf32> to vector<2x11xf32>
    %c0_14 = arith.constant 0 : index
    %c0_15 = arith.constant 0 : index
    %42 = vector.load %arg7[%c0_14, %c0_15] : memref<1x11xf32, #tpu.memory_space<vmem>>, vector<1x11xf32>
    %43 = vector.broadcast %42 : vector<1x11xf32> to vector<2x11xf32>
    %44 = arith.addf %41, %43 : vector<2x11xf32>
    %c0_16 = arith.constant 0 : index
    %c0_17 = arith.constant 0 : index
    %45 = vector.load %arg8[%c0_16, %c0_17] : memref<2x11xf32, #tpu.memory_space<vmem>>, vector<2x11xf32>
    tpu.vector_store %arg8[%c0_16, %c0_17], %44 {strides = array<i32>} : memref<2x11xf32, #tpu.memory_space<vmem>>, vector<2x11xf32>,
    return
  }
  func.func @transform_0(%arg0: i32) -> (i32, i32) {
    %c0_i32 = arith.constant 0 : i32
    %c0_i32_0 = arith.constant 0 : i32
    return %arg0, %c0_i32 : i32, i32
  }
  func.func @transform_1(%arg0: i32) -> (i32, i32) {
    %c0_i32 = arith.constant 0 : i32
    %c0_i32_0 = arith.constant 0 : i32
    %c0_i32_1 = arith.constant 0 : i32
    return %c0_i32, %c0_i32_0 : i32, i32
  }
  func.func @transform_2(%arg0: i32) -> (i32, i32) {
    %c0_i32 = arith.constant 0 : i32
    %c0_i32_0 = arith.constant 0 : i32
    %c0_i32_1 = arith.constant 0 : i32
    return %c0_i32, %c0_i32_0 : i32, i32
  }
  func.func @transform_3(%arg0: i32) -> (i32, i32) {
    %c0_i32 = arith.constant 0 : i32
    %c0_i32_0 = arith.constant 0 : i32
    %c0_i32_1 = arith.constant 0 : i32
    return %c0_i32, %c0_i32_0 : i32, i32
  }
  func.func @transform_4(%arg0: i32) -> (i32, i32) {
    %c0_i32 = arith.constant 0 : i32
    %c0_i32_0 = arith.constant 0 : i32
    %c0_i32_1 = arith.constant 0 : i32
    return %c0_i32, %c0_i32_0 : i32, i32
  }
  func.func @transform_5(%arg0: i32) -> (i32, i32) {
    %c0_i32 = arith.constant 0 : i32
    %c0_i32_0 = arith.constant 0 : i32
    %c0_i32_1 = arith.constant 0 : i32
    return %c0_i32, %c0_i32_0 : i32, i32
  }
  func.func @transform_6(%arg0: i32) -> (i32, i32) {
    %c0_i32 = arith.constant 0 : i32
    %c0_i32_0 = arith.constant 0 : i32
    %c0_i32_1 = arith.constant 0 : i32
    return %c0_i32, %c0_i32_0 : i32, i32
  }
  func.func @transform_7(%arg0: i32) -> (i32, i32) {
    %c0_i32 = arith.constant 0 : i32
    %c0_i32_0 = arith.constant 0 : i32
    return %arg0, %c0_i32 : i32, i32
  }
}

module attributes {stable_mosaic.version = 11 : i64} {
  func.func @qfunction_kernel(%arg0: i32, %arg1: memref<2x4xf32, #tpu.memory_space<vmem>>, %arg2: memref<4x128xf32, #tpu.memory_space<vmem>>, %arg3: memref<1x128xf32, #tpu.memory_space<vmem>>, %arg4: memref<128x128xbf16, #tpu.memory_space<vmem>>, %arg5: memref<1x128xf32, #tpu.memory_space<vmem>>, %arg6: memref<128x128xbf16, #tpu.memory_space<vmem>>, %arg7: memref<1x11xf32, #tpu.memory_space<vmem>>, %arg8: memref<2x11xf32, #tpu.memory_space<vmem>>) attributes {dimension_semantics = [#tpu.dimension_semantics<parallel>], iteration_bounds = array<i64: 1>, scalar_prefetch = 0 : i64, scratch_operands = 0 : i64, tpu.core_type = #tpu.core_type<tc>, window_params = [{transform_indices = @transform_0, window_bounds = array<i64: 2, 4>}, {pipeline_mode = #tpu.pipeline_mode<synchronous>, transform_indices = @transform_1, window_bounds = array<i64: 4, 128>}, {pipeline_mode = #tpu.pipeline_mode<synchronous>, transform_indices = @transform_2, window_bounds = array<i64: 1, 128>}, {pipeline_mode = #tpu.pipeline_mode<synchronous>, transform_indices = @transform_3, window_bounds = array<i64: 128, 128>}, {pipeline_mode = #tpu.pipeline_mode<synchronous>, transform_indices = @transform_4, window_bounds = array<i64: 1, 128>}, {pipeline_mode = #tpu.pipeline_mode<synchronous>, transform_indices = @transform_5, window_bounds = array<i64: 128, 128>}, {pipeline_mode = #tpu.pipeline_mode<synchronous>, transform_indices = @transform_6, window_bounds = array<i64: 1, 11>}, {transform_indices = @transform_7, window_bounds = array<i64: 2, 11>}]} {
    %c0 = arith.constant 0 : index
    %c0_0 = arith.constant 0 : index
    %0 = vector.load %arg1[%c0, %c0_0] : memref<2x4xf32, #tpu.memory_space<vmem>>, vector<2x4xf32>
    %c0_1 = arith.constant 0 : index
    %c0_2 = arith.constant 0 : index
    %1 = vector.load %arg2[%c0_1, %c0_2] : memref<4x128xf32, #tpu.memory_space<vmem>>, vector<4x128xf32>
    %2 = vector.extract_strided_slice %0 {offsets = [0, 0], sizes = [2, 1], strides = [1, 1]} : vector<2x4xf32> to vector<2x1xf32>
    %3 = vector.extract_strided_slice %1 {offsets = [0, 0], sizes = [1, 128], strides = [1, 1]} : vector<4x128xf32> to vector<1x128xf32>
    %4 = vector.broadcast %2 : vector<2x1xf32> to vector<2x128xf32>
    %5 = vector.broadcast %3 : vector<1x128xf32> to vector<2x128xf32>
    %6 = arith.mulf %4, %5 : vector<2x128xf32>
    %7 = vector.extract_strided_slice %0 {offsets = [0, 1], sizes = [2, 1], strides = [1, 1]} : vector<2x4xf32> to vector<2x1xf32>
    %8 = vector.extract_strided_slice %1 {offsets = [1, 0], sizes = [1, 128], strides = [1, 1]} : vector<4x128xf32> to vector<1x128xf32>
    %9 = vector.broadcast %7 : vector<2x1xf32> to vector<2x128xf32>
    %10 = vector.broadcast %8 : vector<1x128xf32> to vector<2x128xf32>
    %11 = arith.mulf %9, %10 : vector<2x128xf32>
    %12 = arith.addf %6, %11 : vector<2x128xf32>
    %13 = vector.extract_strided_slice %0 {offsets = [0, 2], sizes = [2, 1], strides = [1, 1]} : vector<2x4xf32> to vector<2x1xf32>
    %14 = vector.extract_strided_slice %1 {offsets = [2, 0], sizes = [1, 128], strides = [1, 1]} : vector<4x128xf32> to vector<1x128xf32>
    %15 = vector.broadcast %13 : vector<2x1xf32> to vector<2x128xf32>
    %16 = vector.broadcast %14 : vector<1x128xf32> to vector<2x128xf32>
    %17 = arith.mulf %15, %16 : vector<2x128xf32>
    %18 = arith.addf %12, %17 : vector<2x128xf32>
    %19 = vector.extract_strided_slice %0 {offsets = [0, 3], sizes = [2, 1], strides = [1, 1]} : vector<2x4xf32> to vector<2x1xf32>
    %20 = vector.extract_strided_slice %1 {offsets = [3, 0], sizes = [1, 128], strides = [1, 1]} : vector<4x128xf32> to vector<1x128xf32>
    %21 = vector.broadcast %19 : vector<2x1xf32> to vector<2x128xf32>
    %22 = vector.broadcast %20 : vector<1x128xf32> to vector<2x128xf32>
    %23 = arith.mulf %21, %22 : vector<2x128xf32>
    %24 = arith.addf %18, %23 : vector<2x128xf32>
    %c0_3 = arith.constant 0 : index
    %c0_4 = arith.constant 0 : index
    %25 = vector.load %arg3[%c0_3, %c0_4] : memref<1x128xf32, #tpu.memory_space<vmem>>, vector<1x128xf32>
    %26 = vector.broadcast %25 : vector<1x128xf32> to vector<2x128xf32>
    %27 = arith.addf %24, %26 : vector<2x128xf32>
    %cst = arith.constant 0.000000e+00 : f32
    %28 = vector.broadcast %cst : f32 to vector<2x128xf32>
    %29 = arith.maximumf %27, %28 : vector<2x128xf32>
    %30 = arith.truncf %29 : vector<2x128xf32> to vector<2x128xbf16>
    %c0_5 = arith.constant 0 : index
    %c0_6 = arith.constant 0 : index
    %31 = vector.load %arg4[%c0_5, %c0_6] : memref<128x128xbf16, #tpu.memory_space<vmem>>, vector<128x128xbf16>
    %cst_7 = arith.constant dense<0.000000e+00> : vector<2x128xf32>
    %32 = tpu.matmul %30, %31, %cst_7 {dimension_numbers = #tpu.dot_dimension_numbers<[1], [0], [0], [1], [0, 0, 1, 1], [], []>} : vector<2x128xbf16>, vector<128x128xbf16>, vector<2x128xf32> -> vector<2x128xf32>
    %c0_8 = arith.constant 0 : index
    %c0_9 = arith.constant 0 : index
    %33 = vector.load %arg5[%c0_8, %c0_9] : memref<1x128xf32, #tpu.memory_space<vmem>>, vector<1x128xf32>
    %34 = vector.broadcast %33 : vector<1x128xf32> to vector<2x128xf32>
    %35 = arith.addf %32, %34 : vector<2x128xf32>
    %cst_10 = arith.constant 0.000000e+00 : f32
    %36 = vector.broadcast %cst_10 : f32 to vector<2x128xf32>
    %37 = arith.maximumf %35, %36 : vector<2x128xf32>
    %38 = arith.truncf %37 : vector<2x128xf32> to vector<2x128xbf16>
    %c0_11 = arith.constant 0 : index
    %c0_12 = arith.constant 0 : index
    %39 = vector.load %arg6[%c0_11, %c0_12] : memref<128x128xbf16, #tpu.memory_space<vmem>>, vector<128x128xbf16>
    %cst_13 = arith.constant dense<0.000000e+00> : vector<2x128xf32>
    %40 = tpu.matmul %38, %39, %cst_13 {dimension_numbers = #tpu.dot_dimension_numbers<[1], [0], [0], [1], [0, 0, 1, 1], [], []>} : vector<2x128xbf16>, vector<128x128xbf16>, vector<2x128xf32> -> vector<2x128xf32>
    %41 = vector.extract_strided_slice %40 {offsets = [0, 0], sizes = [2, 11], strides = [1, 1]} : vector<2x128xf32> to vector<2x11xf32>
    %c0_14 = arith.constant 0 : index
    %c0_15 = arith.constant 0 : index
    %42 = vector.load %arg7[%c0_14, %c0_15] : memref<1x11xf32, #tpu.memory_space<vmem>>, vector<1x11xf32>
    %43 = vector.broadcast %42 : vector<1x11xf32> to vector<2x11xf32>
    %44 = arith.addf %41, %43 : vector<2x11xf32>
    %c0_16 = arith.constant 0 : index
    %c0_17 = arith.constant 0 : index
    %45 = vector.load %arg8[%c0_16, %c0_17] : memref<2x11xf32, #tpu.memory_space<vmem>>, vector<2x11xf32>
    tpu.vector_store %arg8[%c0_16, %c0_17], %44 {strides = array<i32>} : memref<2x11xf32, #tpu.memory_space<vmem>>, vector<2x11xf32>,
    return
  }
  func.func @transform_0(%arg0: i32) -> (i32, i32) {
    %c0_i32 = arith.constant 0 : i32
    %c0_i32_0 = arith.constant 0 : i32
    return %arg0, %c0_i32 : i32, i32
  }
  func.func @transform_1(%arg0: i32) -> (i32, i32) {
    %c0_i32 = arith.constant 0 : i32
    %c0_i32_0 = arith.constant 0 : i32
    %c0_i32_1 = arith.constant 0 : i32
    return %c0_i32, %c0_i32_0 : i32, i32
  }
  func.func @transform_2(%arg0: i32) -> (i32, i32) {
    %c0_i32 = arith.constant 0 : i32
    %c0_i32_0 = arith.constant 0 : i32
    %c0_i32_1 = arith.constant 0 : i32
    return %c0_i32, %c0_i32_0 : i32, i32
  }
  func.func @transform_3(%arg0: i32) -> (i32, i32) {
    %c0_i32 = arith.constant 0 : i32
    %c0_i32_0 = arith.constant 0 : i32
    %c0_i32_1 = arith.constant 0 : i32
    return %c0_i32, %c0_i32_0 : i32, i32
  }
  func.func @transform_4(%arg0: i32) -> (i32, i32) {
    %c0_i32 = arith.constant 0 : i32
    %c0_i32_0 = arith.constant 0 : i32
    %c0_i32_1 = arith.constant 0 : i32
    return %c0_i32, %c0_i32_0 : i32, i32
  }
  func.func @transform_5(%arg0: i32) -> (i32, i32) {
    %c0_i32 = arith.constant 0 : i32
    %c0_i32_0 = arith.constant 0 : i32
    %c0_i32_1 = arith.constant 0 : i32
    return %c0_i32, %c0_i32_0 : i32, i32
  }
  func.func @transform_6(%arg0: i32) -> (i32, i32) {
    %c0_i32 = arith.constant 0 : i32
    %c0_i32_0 = arith.constant 0 : i32
    %c0_i32_1 = arith.constant 0 : i32
    return %c0_i32, %c0_i32_0 : i32, i32
  }
  func.func @transform_7(%arg0: i32) -> (i32, i32) {
    %c0_i32 = arith.constant 0 : i32
    %c0_i32_0 = arith.constant 0 : i32
    return %arg0, %c0_i32 : i32, i32
  }
}

</mosaic_0001>

<bundles_post_ra>
// kernel: tpu_custom_call.1
= control target key start
LH: loop header
LB: loop body
LE: loop exit
PB: predicated region body
PF: predicated region fallthrough
CT: control target
= control target key end

     0   :  { %s661_s24 = sld [smem:[#allocation0]]   ;;  %s716_s0 = inlined_call_operand.hbm [shape: f32[2,4], index: 0, kind: input, shape index: {}]   ;;  %s717_s1 = inlined_call_operand.hbm [shape: f32[4,128], index: 1, kind: input, shape index: {}]   ;;  %s718_s2 = inlined_call_operand.vmem [shape: f32[1,128], index: 2, kind: input, shape index: {}]   ;;  %s719_s3 = inlined_call_operand.hbm [shape: bf16[128,128], index: 3, kind: input, shape index: {}]   ;;  %s720_s4 = inlined_call_operand.vmem [shape: f32[1,128], index: 4, kind: input, shape index: {}]   ;;  %s721_s5 = inlined_call_operand.hbm [shape: bf16[128,128], index: 5, kind: input, shape index: {}]   ;;  %s722_s6 = inlined_call_operand.vmem [shape: f32[1,11], index: 6, kind: input, shape index: {}]   ;;  %s723_s7 = inlined_call_operand.hbm [shape: f32[2,11], index: 7, kind: output, shape index: {}]  }
   0x1   :  { %12 = vsyncpa [#allocation3], 0 }
   0x2   :  { %13 = vsyncpa [#allocation6], 0 }
   0x3   :  { %14 = vsyncpa [#allocation9], 0 }
   0x4   :  { %15 = vsyncpa [#allocation4], 0  ;;  %s608_s26 = smov [#allocation5]  }
   0x5   :  { %s34_s27 = sshll.u32 %s608_s26, 4  ;;  %s35_s27 = int_to_ptr.vmem [resolvable:$true] %s34_s27 }
   0x6   :  { %s383_s25 = sshll.u32 %s661_s24, 5  ;;  %s504_s8 = scalar_lea.vmem %s35_s27, 64 }
   0x7   :  { %s22_s30 = scalar_lea.hbm %s716_s0, %s383_s25  ;;  %p505_p0 = scmp.ne.s32.totalorder %s35_s27, %s504_s8 }
   0x8   :  { %p509_p1 = scmp.lt.s32.totalorder %s35_s27, %s35_s27  ;;  %p510_p2 = scmp.lt.s32.totalorder %s504_s8, %s504_s8 }
   0xa   :  { %p511_p3 = por %p510_p2, %p509_p1 }
   0xc   :  { %p512_p4 = pnand %p511_p3, %p505_p0 }
   0xe   :  { %515 = shalt.err (!%p512_p4)
}
   0xf   :  { %37 = dma.hbm_to_vmem [thread:$0]  %s717_s1, 64, %s35_s27, [#allocation6]  }
  0x10   :  { %s609_s11 = smov [#allocation2]   ;;  %s610_s13 = smov [#allocation7]  }
  0x11   :  { %s24_s12 = sshll.u32 %s609_s11, 4  ;;  %s45_s14 = sshll.u32 %s610_s13, 4  ;;  %s25_s12 = int_to_ptr.vmem [resolvable:$true] %s24_s12  ;;  %s46_s14 = int_to_ptr.vmem [resolvable:$true] %s45_s14 }
  0x12   :  { %s516_s15 = scalar_lea.hbm %s22_s30, 32  ;;  %s518_s18 = scalar_lea.hbm %s716_s0, 32 }
  0x13   :  { %p517_p5 = scmp.ne.s32.totalorder %s22_s30, %s516_s15  ;;  %p520_p6 = scmp.lt.s32.totalorder %s518_s18, %s516_s15 }
  0x15   :  { %p522_p7 = pnand %p520_p6, %p517_p5 }
  0x17   :  { %525 = shalt.err (!%p522_p7)
}
  0x18   :  { %s526_s19 = scalar_lea.vmem %s25_s12, 32  ;;  %p531_p9 = scmp.lt.s32.totalorder %s25_s12, %s25_s12 }
  0x19   :  { %p527_p8 = scmp.ne.s32.totalorder %s25_s12, %s526_s19  ;;  %p532_p10 = scmp.lt.s32.totalorder %s526_s19, %s526_s19 }
  0x1b   :  { %p533_p11 = por %p532_p10, %p531_p9 }
  0x1d   :  { %p534_p12 = pnand %p533_p11, %p527_p8 }
  0x1f   :  { %537 = shalt.err (!%p534_p12)
}
  0x20   :  { %27 = dma.hbm_to_vmem [thread:$0]  %s22_s30, 32, %s25_s12, [#allocation3]  }
  0x21   :  { %s546_s1 = scalar_lea.vmem %s46_s14, 1024  ;;  %p551_p0 = scmp.lt.s32.totalorder %s46_s14, %s46_s14 }
  0x22   :  { %p547_p13 = scmp.ne.s32.totalorder %s46_s14, %s546_s1  ;;  %p552_p1 = scmp.lt.s32.totalorder %s546_s1, %s546_s1 }
  0x24   :  { %p553_p2 = por %p552_p1, %p551_p0 }
  0x26   :  { %p554_p3 = pnand %p553_p2, %p547_p13 }
  0x28   :  { %557 = shalt.err (!%p554_p3)
}
  0x29   :  { %s611_s0 = smov 64   ;;  %s612_s20 = smov 4  }
  0x2a   :  { %51 = dma.hbm_to_vmem [thread:$0]  %s719_s3, 1024, %s46_s14, [#allocation6], %s611_s0, %s611_s0, %s612_s20  }
  0x2b   :  { %s613_s23 = smov [#allocation8]  }
  0x2c   :  { %s59_s26 = sshll.u32 %s613_s23, 4  ;;  %s60_s26 = int_to_ptr.vmem [resolvable:$true] %s59_s26 }
  0x2d   :  { %s566_s27 = scalar_lea.vmem %s60_s26, 1024  ;;  %p571_p5 = scmp.lt.s32.totalorder %s60_s26, %s60_s26 }
  0x2e   :  { %p567_p4 = scmp.ne.s32.totalorder %s60_s26, %s566_s27  ;;  %p572_p6 = scmp.lt.s32.totalorder %s566_s27, %s566_s27 }
  0x30   :  { %p573_p7 = por %p572_p6, %p571_p5 }
  0x32   :  { %p574_p8 = pnand %p573_p7, %p567_p4 }
  0x34   :  { %577 = shalt.err (!%p574_p8)
}
  0x35   :  { %65 = dma.hbm_to_vmem [thread:$0]  %s721_s5, 1024, %s60_s26, [#allocation9], %s611_s0, %s611_s0, %s612_s20  }
  0x36   :  { %600 = dma.done.wait [#allocation3], 32  }
  0x37   :  { %601 = vsyncadd [#allocation3], 4294967264 }
  0x38   :  { %602 = dma.done.wait [#allocation6], 1088  }
  0x39   :  { %603 = vsyncadd [#allocation6], 4294966208 }
  0x3a   :  { %604 = dma.done.wait [#allocation9], 1024  }
  0x3b   :  { %605 = vsyncadd [#allocation9], 4294966272  ;;  %v614_v0 = vmov 0   ;;  %v615_v1 = vmov 2   ;;  %v616_v2 = vmov 0.0   ;;  %v480_v4 = vld [vmem:[#allocation7 + $0x38] sm:$0xff]   ;;  %v88_v20 = vlaneseq  ;;  %s366_s13 = scalar_lea.hbm %s723_s7, %s383_s25 }
  0x3c   :  { %475 = vset.pattern.permute.xlu0 %v614_v0  ;;  %477 = vset.pattern.permute.xlu1 %v615_v1  ;;  %v81_v3 = vld [vmem:[#allocation2] sm:$0x3]  ;;  %v481_v5 = vld [vmem:[#allocation7 + $0x30] sm:$0xff]   ;;  %v617_v6 = vmov 1   ;;  %v618_v7 = vmov 3   ;;  %v482_v8 = vld [vmem:[#allocation7 + $0x28] sm:$0xff]  }
  0x3d   :  { %422 = vmatprep.subr.bf16.mxu0 %v616_v2  ;;  %442 = vmatprep.subr.bf16.mxu1 %v616_v2  ;;  %v483_v9 = vld [vmem:[#allocation7 + $0x20] sm:$0xff]   ;;  %vm619_vm0 = vmmov 0   ;;  %v484_v10 = vld [vmem:[#allocation7 + $0x18] sm:$0xff]   ;;  %v489_v12 = vld [vmem:[#allocation8 + $0x30] sm:$0xff]   ;;  %v89_v21 = vshrl.u32 %v88_v20, 7  ;;  %s620_s10 = smov [#allocation10]  }
  0x3e   :  { %85 = vperm.xlu0 %475, %v81_v3   ;;  %104 = vperm.xlu1 %477, %v81_v3   ;;  %v488_v11 = vld [vmem:[#allocation8 + $0x38] sm:$0xff]   ;;  %v485_v13 = vld [vmem:[#allocation7 + $0x10] sm:$0xff]   ;;  %v490_v14 = vld [vmem:[#allocation8 + $0x28] sm:$0xff]   ;;  %s368_s11 = sshll.u32 %s620_s10, 4  ;;  %vm358_vm1 = vcmask 82944   ;;  %s369_s11 = int_to_ptr.vmem [resolvable:$true] %s368_s11 }
  0x3f   :  { %423 = vmatpush3.bf16.msra.mxu0 %v480_v4  ;;  %438 = vmatprep.mubr.msk.bf16.mxu0 %vm619_vm0, %v616_v2  ;;  %v486_v15 = vld [vmem:[#allocation7 + $0x8] sm:$0xff]   ;;  %v491_v16 = vld [vmem:[#allocation8 + $0x20] sm:$0xff]   ;;  %v492_v18 = vld [vmem:[#allocation8 + $0x18] sm:$0xff]   ;;  %v90_v22 = vsub.s32 0, %v89_v21  ;;  %v99_v23 = vsub.s32 1, %v89_v21  ;;  %v109_v26 = vsub.s32 2, %v89_v21  ;;  %p583_p10 = scmp.lt.s32.totalorder %s369_s11, %s369_s11 }
  0x40   :  { %424 = vmatprep.subr.bf16.mxu0 %v616_v2  ;;  %458 = vmatprep.mubr.msk.bf16.mxu1 %vm619_vm0, %v616_v2  ;;  %v487_v17 = vld [vmem:[#allocation7] sm:$0xff]   ;;  %v493_v19 = vld [vmem:[#allocation8 + $0x10] sm:$0xff]   ;;  %v82_v24 = vld [vmem:[#allocation5] sm:$0xf]  ;;  %v119_v28 = vsub.s32 3, %v89_v21  ;;  %s578_s14 = scalar_lea.vmem %s369_s11, 32 }
  0x41   :  { %443 = vmatpush3.bf16.msra.mxu1 %v488_v11  ;;  %v91_v29 = vrot.slane %v82_v24, %v90_v22  ;;  %v100_v30 = vrot.slane %v82_v24, %v99_v23  ;;  %v110_v31 = vrot.slane %v82_v24, %v109_v26  ;;  %v384_v41 = vld [vmem:[%s718_s2] ss:$0 sm:$0xff]  ;;  %v494_v46 = vld [vmem:[#allocation8 + $0x8] sm:$0xff]   ;;  %v495_v47 = vld [vmem:[#allocation8] sm:$0xff]   ;;  %p579_p9 = scmp.ne.s32.totalorder %s369_s11, %s578_s14  ;;  %p584_p11 = scmp.lt.s32.totalorder %s578_s14, %s578_s14 }
  0x42   :  { %476 = vset.pattern.permute.xlu0 %v617_v6  ;;  %478 = vset.pattern.permute.xlu1 %v618_v7  ;;  %v120_v32 = vrot.slane %v82_v24, %v119_v28  ;;  %v385_v48 = vld [vmem:[%s720_s4] ss:$0 sm:$0xff] }
  0x43   :  { %94 = vperm.xlu0 %476, %v81_v3   ;;  %114 = vperm.xlu1 %478, %v81_v3   ;;  %v402_v56 = vld [vmem:[%s722_s6] ss:$0 sm:$0xff]  ;;  %p585_p12 = por %p584_p11, %p583_p10 }
  0x44   :  { %425 = vmatpush3.bf16.msra.mxu0 %v481_v5  ;;  %444 = vmatprep.subr.bf16.mxu1 %v616_v2 }
  0x45   :  { %426 = vmatprep.subr.bf16.mxu0 %v616_v2  ;;  %445 = vmatpush3.bf16.msra.mxu1 %v489_v12  ;;  %p586_p13 = pnand %p585_p12, %p579_p9 }
  0x46   :  { %446 = vmatprep.subr.bf16.mxu1 %v616_v2 }
  0x47   :  { %479 = vset.pattern.permute.xlu0 %v618_v7 }
  0x48   :  { %427 = vmatpush3.bf16.msra.mxu0 %v482_v8 }
  0x49   :  { %428 = vmatprep.subr.bf16.mxu0 %v616_v2  ;;  %447 = vmatpush3.bf16.msra.mxu1 %v490_v14 }
  0x4a   :  { %448 = vmatprep.subr.bf16.mxu1 %v616_v2 }
  0x4c   :  { %429 = vmatpush3.bf16.msra.mxu0 %v483_v9 }
  0x4d   :  { %430 = vmatprep.subr.bf16.mxu0 %v616_v2  ;;  %449 = vmatpush3.bf16.msra.mxu1 %v491_v16 }
  0x4e   :  { %450 = vmatprep.subr.bf16.mxu1 %v616_v2 }
  0x50   :  { %431 = vmatpush3.bf16.msra.mxu0 %v484_v10 }
  0x51   :  { %432 = vmatprep.subr.bf16.mxu0 %v616_v2  ;;  %451 = vmatpush3.bf16.msra.mxu1 %v492_v18 }
  0x52   :  { %452 = vmatprep.subr.bf16.mxu1 %v616_v2 }
  0x54   :  { %433 = vmatpush3.bf16.msra.mxu0 %v485_v13 }
  0x55   :  { %434 = vmatprep.subr.bf16.mxu0 %v616_v2  ;;  %453 = vmatpush3.bf16.msra.mxu1 %v493_v19 }
  0x56   :  { %454 = vmatprep.subr.bf16.mxu1 %v616_v2 }
  0x58   :  { %435 = vmatpush3.bf16.msra.mxu0 %v486_v15 }
  0x59   :  { %436 = vmatprep.subr.bf16.mxu0 %v616_v2  ;;  %455 = vmatpush3.bf16.msra.mxu1 %v494_v46 }
  0x5a   :  { %456 = vmatprep.subr.bf16.mxu1 %v616_v2 }
  0x5c   :  { %437 = vmatpush3.bf16.msra.mxu0 %v487_v17 }
  0x5d   :  { %457 = vmatpush3.bf16.msra.mxu1 %v495_v47 }
  0xb9   :  { %v86_v25 = vpop.permute.xlu0 %85  ;;  %v105_v27 = vpop.permute.xlu1 %104 }
  0xba   :  { %v92_v35 = vmul.f32 %v91_v29, %v86_v25  ;;  %v111_v37 = vmul.f32 %v110_v31, %v105_v27 }
  0xbe   :  { %v95_v33 = vpop.permute.xlu0 %94  ;;  %v115_v34 = vpop.permute.xlu1 %114 }
  0xbf   :  { %v101_v36 = vmul.f32 %v100_v30, %v95_v33  ;;  %v121_v39 = vmul.f32 %v120_v32, %v115_v34 }
  0xc1   :  { %v102_v38 = vadd.f32 %v101_v36, %v92_v35 }
  0xc3   :  { %v112_v40 = vadd.f32 %v111_v37, %v102_v38 }
  0xc5   :  { %v122_v42 = vadd.f32 %v121_v39, %v112_v40 }
  0xc7   :  { %v130_v43 = vadd.f32 %v384_v41, %v122_v42 }
  0xc9   :  { %v131_v44 = vmax.f32 %v130_v43, 0.0 }
  0xcb   :  { %v132_v45 = vpack.c.bf16 %v131_v44, %v131_v44 }
  0xcd   :  { %439 = vmatmul.mubr.bf16.vlgmr.msra.gmra.mxu0 %v132_v45 }
 0x18d   :  { %v238_v49 = vpop.f32.mrf.mxu0 }
 0x18e   :  { %v239_v50 = vadd.f32 %v385_v48, %v238_v49 }
 0x18f   :  { %v440_v51 = vpop.f32.mrf.mxu0 }
 0x190   :  { %v244_v52 = vmax.f32 %v239_v50, 0.0 }
 0x191   :  { %v241_v53 = vpop.f32.mrf.mxu0 }
 0x192   :  { %v245_v54 = vpack.c.bf16 %v244_v52, %v244_v52 }
 0x193   :  { %v441_v55 = vpop.f32.mrf.mxu0 }
 0x194   :  { %459 = vmatmul.mubr.bf16.vlgmr.msra.gmra.mxu1 %v245_v54 }
 0x254   :  { %v344_v57 = vpop.f32.mrf.mxu1 }
 0x255   :  { %v357_v58 = vadd.f32 %v402_v56, %v344_v57 }
 0x256   :  { %v460_v59 = vpop.f32.mrf.mxu1 }
 0x257   :  { %359 = vst.msk [vmem:[#allocation10] sm:$0x3] %vm358_vm1, %v357_v58 }
 0x258   :  { %v347_v60 = vpop.f32.mrf.mxu1 }
 0x259   :  { %589 = shalt.err (!%p586_p13)
}
 0x25a   :  { %s590_s6 = scalar_lea.hbm %s366_s13, 32  ;;  %s592_s24 = scalar_lea.hbm %s723_s7, 32 }
 0x25b   :  { %p591_p0 = scmp.ne.s32.totalorder %s366_s13, %s590_s6  ;;  %p594_p1 = scmp.lt.s32.totalorder %s592_s24, %s590_s6 }
 0x25d   :  { %p596_p2 = pnand %p594_p1, %p591_p0 }
 0x25f   :  { %599 = shalt.err (!%p596_p2)
}
 0x260   :  { %371 = dma.vmem_to_hbm [thread:$0]  %s369_s11, 32, %s366_s13, [#allocation4]   ;;  %v461_v61 = vpop.f32.mrf.mxu1 }
 0x261   :  { %606 = dma.done.wait [#allocation4], 32  }
 0x262   :  { %607 = vsyncadd [#allocation4], 4294967264 }
 0x263   :  { %375 = vsyncpa [#allocation3], 1 }
 0x264   :  { %376 = vsyncpa [#allocation6], 1 }
 0x265   :  { %377 = vsyncpa [#allocation9], 1 }
 0x266   :  { %378 = vsyncpa [#allocation4], 1 }

// kernel: tpu_custom_call.1
= control target key start
LH: loop header
LB: loop body
LE: loop exit
PB: predicated region body
PF: predicated region fallthrough
CT: control target
= control target key end

     0   :  { %s661_s24 = sld [smem:[#allocation0]]   ;;  %s716_s0 = inlined_call_operand.hbm [shape: f32[2,4], index: 0, kind: input, shape index: {}]   ;;  %s717_s1 = inlined_call_operand.hbm [shape: f32[4,128], index: 1, kind: input, shape index: {}]   ;;  %s718_s2 = inlined_call_operand.vmem [shape: f32[1,128], index: 2, kind: input, shape index: {}]   ;;  %s719_s3 = inlined_call_operand.hbm [shape: bf16[128,128], index: 3, kind: input, shape index: {}]   ;;  %s720_s4 = inlined_call_operand.vmem [shape: f32[1,128], index: 4, kind: input, shape index: {}]   ;;  %s721_s5 = inlined_call_operand.hbm [shape: bf16[128,128], index: 5, kind: input, shape index: {}]   ;;  %s722_s6 = inlined_call_operand.vmem [shape: f32[1,11], index: 6, kind: input, shape index: {}]   ;;  %s723_s7 = inlined_call_operand.hbm [shape: f32[2,11], index: 7, kind: output, shape index: {}]  }
   0x1   :  { %12 = vsyncpa [#allocation3], 0 }
   0x2   :  { %13 = vsyncpa [#allocation6], 0 }
   0x3   :  { %14 = vsyncpa [#allocation9], 0 }
   0x4   :  { %15 = vsyncpa [#allocation4], 0  ;;  %s608_s26 = smov [#allocation5]  }
   0x5   :  { %s34_s27 = sshll.u32 %s608_s26, 4  ;;  %s35_s27 = int_to_ptr.vmem [resolvable:$true] %s34_s27 }
   0x6   :  { %s383_s25 = sshll.u32 %s661_s24, 5  ;;  %s504_s8 = scalar_lea.vmem %s35_s27, 64 }
   0x7   :  { %s22_s30 = scalar_lea.hbm %s716_s0, %s383_s25  ;;  %p505_p0 = scmp.ne.s32.totalorder %s35_s27, %s504_s8 }
   0x8   :  { %p509_p1 = scmp.lt.s32.totalorder %s35_s27, %s35_s27  ;;  %p510_p2 = scmp.lt.s32.totalorder %s504_s8, %s504_s8 }
   0xa   :  { %p511_p3 = por %p510_p2, %p509_p1 }
   0xc   :  { %p512_p4 = pnand %p511_p3, %p505_p0 }
   0xe   :  { %515 = shalt.err (!%p512_p4)
}
   0xf   :  { %37 = dma.hbm_to_vmem [thread:$0]  %s717_s1, 64, %s35_s27, [#allocation6]  }
  0x10   :  { %s609_s11 = smov [#allocation2]   ;;  %s610_s13 = smov [#allocation7]  }
  0x11   :  { %s24_s12 = sshll.u32 %s609_s11, 4  ;;  %s45_s14 = sshll.u32 %s610_s13, 4  ;;  %s25_s12 = int_to_ptr.vmem [resolvable:$true] %s24_s12  ;;  %s46_s14 = int_to_ptr.vmem [resolvable:$true] %s45_s14 }
  0x12   :  { %s516_s15 = scalar_lea.hbm %s22_s30, 32  ;;  %s518_s18 = scalar_lea.hbm %s716_s0, 32 }
  0x13   :  { %p517_p5 = scmp.ne.s32.totalorder %s22_s30, %s516_s15  ;;  %p520_p6 = scmp.lt.s32.totalorder %s518_s18, %s516_s15 }
  0x15   :  { %p522_p7 = pnand %p520_p6, %p517_p5 }
  0x17   :  { %525 = shalt.err (!%p522_p7)
}
  0x18   :  { %s526_s19 = scalar_lea.vmem %s25_s12, 32  ;;  %p531_p9 = scmp.lt.s32.totalorder %s25_s12, %s25_s12 }
  0x19   :  { %p527_p8 = scmp.ne.s32.totalorder %s25_s12, %s526_s19  ;;  %p532_p10 = scmp.lt.s32.totalorder %s526_s19, %s526_s19 }
  0x1b   :  { %p533_p11 = por %p532_p10, %p531_p9 }
  0x1d   :  { %p534_p12 = pnand %p533_p11, %p527_p8 }
  0x1f   :  { %537 = shalt.err (!%p534_p12)
}
  0x20   :  { %27 = dma.hbm_to_vmem [thread:$0]  %s22_s30, 32, %s25_s12, [#allocation3]  }
  0x21   :  { %s546_s1 = scalar_lea.vmem %s46_s14, 1024  ;;  %p551_p0 = scmp.lt.s32.totalorder %s46_s14, %s46_s14 }
  0x22   :  { %p547_p13 = scmp.ne.s32.totalorder %s46_s14, %s546_s1  ;;  %p552_p1 = scmp.lt.s32.totalorder %s546_s1, %s546_s1 }
  0x24   :  { %p553_p2 = por %p552_p1, %p551_p0 }
  0x26   :  { %p554_p3 = pnand %p553_p2, %p547_p13 }
  0x28   :  { %557 = shalt.err (!%p554_p3)
}
  0x29   :  { %s611_s0 = smov 64   ;;  %s612_s20 = smov 4  }
  0x2a   :  { %51 = dma.hbm_to_vmem [thread:$0]  %s719_s3, 1024, %s46_s14, [#allocation6], %s611_s0, %s611_s0, %s612_s20  }
  0x2b   :  { %s613_s23 = smov [#allocation8]  }
  0x2c   :  { %s59_s26 = sshll.u32 %s613_s23, 4  ;;  %s60_s26 = int_to_ptr.vmem [resolvable:$true] %s59_s26 }
  0x2d   :  { %s566_s27 = scalar_lea.vmem %s60_s26, 1024  ;;  %p571_p5 = scmp.lt.s32.totalorder %s60_s26, %s60_s26 }
  0x2e   :  { %p567_p4 = scmp.ne.s32.totalorder %s60_s26, %s566_s27  ;;  %p572_p6 = scmp.lt.s32.totalorder %s566_s27, %s566_s27 }
  0x30   :  { %p573_p7 = por %p572_p6, %p571_p5 }
  0x32   :  { %p574_p8 = pnand %p573_p7, %p567_p4 }
  0x34   :  { %577 = shalt.err (!%p574_p8)
}
  0x35   :  { %65 = dma.hbm_to_vmem [thread:$0]  %s721_s5, 1024, %s60_s26, [#allocation9], %s611_s0, %s611_s0, %s612_s20  }
  0x36   :  { %600 = dma.done.wait [#allocation3], 32  }
  0x37   :  { %601 = vsyncadd [#allocation3], 4294967264 }
  0x38   :  { %602 = dma.done.wait [#allocation6], 1088  }
  0x39   :  { %603 = vsyncadd [#allocation6], 4294966208 }
  0x3a   :  { %604 = dma.done.wait [#allocation9], 1024  }
  0x3b   :  { %605 = vsyncadd [#allocation9], 4294966272  ;;  %v614_v0 = vmov 0   ;;  %v615_v1 = vmov 2   ;;  %v616_v2 = vmov 0.0   ;;  %v480_v4 = vld [vmem:[#allocation7 + $0x38] sm:$0xff]   ;;  %v88_v20 = vlaneseq  ;;  %s366_s13 = scalar_lea.hbm %s723_s7, %s383_s25 }
  0x3c   :  { %475 = vset.pattern.permute.xlu0 %v614_v0  ;;  %477 = vset.pattern.permute.xlu1 %v615_v1  ;;  %v81_v3 = vld [vmem:[#allocation2] sm:$0x3]  ;;  %v481_v5 = vld [vmem:[#allocation7 + $0x30] sm:$0xff]   ;;  %v617_v6 = vmov 1   ;;  %v618_v7 = vmov 3   ;;  %v482_v8 = vld [vmem:[#allocation7 + $0x28] sm:$0xff]  }
  0x3d   :  { %422 = vmatprep.subr.bf16.mxu0 %v616_v2  ;;  %442 = vmatprep.subr.bf16.mxu1 %v616_v2  ;;  %v483_v9 = vld [vmem:[#allocation7 + $0x20] sm:$0xff]   ;;  %vm619_vm0 = vmmov 0   ;;  %v484_v10 = vld [vmem:[#allocation7 + $0x18] sm:$0xff]   ;;  %v489_v12 = vld [vmem:[#allocation8 + $0x30] sm:$0xff]   ;;  %v89_v21 = vshrl.u32 %v88_v20, 7  ;;  %s620_s10 = smov [#allocation10]  }
  0x3e   :  { %85 = vperm.xlu0 %475, %v81_v3   ;;  %104 = vperm.xlu1 %477, %v81_v3   ;;  %v488_v11 = vld [vmem:[#allocation8 + $0x38] sm:$0xff]   ;;  %v485_v13 = vld [vmem:[#allocation7 + $0x10] sm:$0xff]   ;;  %v490_v14 = vld [vmem:[#allocation8 + $0x28] sm:$0xff]   ;;  %s368_s11 = sshll.u32 %s620_s10, 4  ;;  %vm358_vm1 = vcmask 82944   ;;  %s369_s11 = int_to_ptr.vmem [resolvable:$true] %s368_s11 }
  0x3f   :  { %423 = vmatpush3.bf16.msra.mxu0 %v480_v4  ;;  %438 = vmatprep.mubr.msk.bf16.mxu0 %vm619_vm0, %v616_v2  ;;  %v486_v15 = vld [vmem:[#allocation7 + $0x8] sm:$0xff]   ;;  %v491_v16 = vld [vmem:[#allocation8 + $0x20] sm:$0xff]   ;;  %v492_v18 = vld [vmem:[#allocation8 + $0x18] sm:$0xff]   ;;  %v90_v22 = vsub.s32 0, %v89_v21  ;;  %v99_v23 = vsub.s32 1, %v89_v21  ;;  %v109_v26 = vsub.s32 2, %v89_v21  ;;  %p583_p10 = scmp.lt.s32.totalorder %s369_s11, %s369_s11 }
  0x40   :  { %424 = vmatprep.subr.bf16.mxu0 %v616_v2  ;;  %458 = vmatprep.mubr.msk.bf16.mxu1 %vm619_vm0, %v616_v2  ;;  %v487_v17 = vld [vmem:[#allocation7] sm:$0xff]   ;;  %v493_v19 = vld [vmem:[#allocation8 + $0x10] sm:$0xff]   ;;  %v82_v24 = vld [vmem:[#allocation5] sm:$0xf]  ;;  %v119_v28 = vsub.s32 3, %v89_v21  ;;  %s578_s14 = scalar_lea.vmem %s369_s11, 32 }
  0x41   :  { %443 = vmatpush3.bf16.msra.mxu1 %v488_v11  ;;  %v91_v29 = vrot.slane %v82_v24, %v90_v22  ;;  %v100_v30 = vrot.slane %v82_v24, %v99_v23  ;;  %v110_v31 = vrot.slane %v82_v24, %v109_v26  ;;  %v384_v41 = vld [vmem:[%s718_s2] ss:$0 sm:$0xff]  ;;  %v494_v46 = vld [vmem:[#allocation8 + $0x8] sm:$0xff]   ;;  %v495_v47 = vld [vmem:[#allocation8] sm:$0xff]   ;;  %p579_p9 = scmp.ne.s32.totalorder %s369_s11, %s578_s14  ;;  %p584_p11 = scmp.lt.s32.totalorder %s578_s14, %s578_s14 }
  0x42   :  { %476 = vset.pattern.permute.xlu0 %v617_v6  ;;  %478 = vset.pattern.permute.xlu1 %v618_v7  ;;  %v120_v32 = vrot.slane %v82_v24, %v119_v28  ;;  %v385_v48 = vld [vmem:[%s720_s4] ss:$0 sm:$0xff] }
  0x43   :  { %94 = vperm.xlu0 %476, %v81_v3   ;;  %114 = vperm.xlu1 %478, %v81_v3   ;;  %v402_v56 = vld [vmem:[%s722_s6] ss:$0 sm:$0xff]  ;;  %p585_p12 = por %p584_p11, %p583_p10 }
  0x44   :  { %425 = vmatpush3.bf16.msra.mxu0 %v481_v5  ;;  %444 = vmatprep.subr.bf16.mxu1 %v616_v2 }
  0x45   :  { %426 = vmatprep.subr.bf16.mxu0 %v616_v2  ;;  %445 = vmatpush3.bf16.msra.mxu1 %v489_v12  ;;  %p586_p13 = pnand %p585_p12, %p579_p9 }
  0x46   :  { %446 = vmatprep.subr.bf16.mxu1 %v616_v2 }
  0x47   :  { %479 = vset.pattern.permute.xlu0 %v618_v7 }
  0x48   :  { %427 = vmatpush3.bf16.msra.mxu0 %v482_v8 }
  0x49   :  { %428 = vmatprep.subr.bf16.mxu0 %v616_v2  ;;  %447 = vmatpush3.bf16.msra.mxu1 %v490_v14 }
  0x4a   :  { %448 = vmatprep.subr.bf16.mxu1 %v616_v2 }
  0x4c   :  { %429 = vmatpush3.bf16.msra.mxu0 %v483_v9 }
  0x4d   :  { %430 = vmatprep.subr.bf16.mxu0 %v616_v2  ;;  %449 = vmatpush3.bf16.msra.mxu1 %v491_v16 }
  0x4e   :  { %450 = vmatprep.subr.bf16.mxu1 %v616_v2 }
  0x50   :  { %431 = vmatpush3.bf16.msra.mxu0 %v484_v10 }
  0x51   :  { %432 = vmatprep.subr.bf16.mxu0 %v616_v2  ;;  %451 = vmatpush3.bf16.msra.mxu1 %v492_v18 }
  0x52   :  { %452 = vmatprep.subr.bf16.mxu1 %v616_v2 }
  0x54   :  { %433 = vmatpush3.bf16.msra.mxu0 %v485_v13 }
  0x55   :  { %434 = vmatprep.subr.bf16.mxu0 %v616_v2  ;;  %453 = vmatpush3.bf16.msra.mxu1 %v493_v19 }
  0x56   :  { %454 = vmatprep.subr.bf16.mxu1 %v616_v2 }
  0x58   :  { %435 = vmatpush3.bf16.msra.mxu0 %v486_v15 }
  0x59   :  { %436 = vmatprep.subr.bf16.mxu0 %v616_v2  ;;  %455 = vmatpush3.bf16.msra.mxu1 %v494_v46 }
  0x5a   :  { %456 = vmatprep.subr.bf16.mxu1 %v616_v2 }
  0x5c   :  { %437 = vmatpush3.bf16.msra.mxu0 %v487_v17 }
  0x5d   :  { %457 = vmatpush3.bf16.msra.mxu1 %v495_v47 }
  0xb9   :  { %v86_v25 = vpop.permute.xlu0 %85  ;;  %v105_v27 = vpop.permute.xlu1 %104 }
  0xba   :  { %v92_v35 = vmul.f32 %v91_v29, %v86_v25  ;;  %v111_v37 = vmul.f32 %v110_v31, %v105_v27 }
  0xbe   :  { %v95_v33 = vpop.permute.xlu0 %94  ;;  %v115_v34 = vpop.permute.xlu1 %114 }
  0xbf   :  { %v101_v36 = vmul.f32 %v100_v30, %v95_v33  ;;  %v121_v39 = vmul.f32 %v120_v32, %v115_v34 }
  0xc1   :  { %v102_v38 = vadd.f32 %v101_v36, %v92_v35 }
  0xc3   :  { %v112_v40 = vadd.f32 %v111_v37, %v102_v38 }
  0xc5   :  { %v122_v42 = vadd.f32 %v121_v39, %v112_v40 }
  0xc7   :  { %v130_v43 = vadd.f32 %v384_v41, %v122_v42 }
  0xc9   :  { %v131_v44 = vmax.f32 %v130_v43, 0.0 }
  0xcb   :  { %v132_v45 = vpack.c.bf16 %v131_v44, %v131_v44 }
  0xcd   :  { %439 = vmatmul.mubr.bf16.vlgmr.msra.gmra.mxu0 %v132_v45 }
 0x18d   :  { %v238_v49 = vpop.f32.mrf.mxu0 }
 0x18e   :  { %v239_v50 = vadd.f32 %v385_v48, %v238_v49 }
 0x18f   :  { %v440_v51 = vpop.f32.mrf.mxu0 }
 0x190   :  { %v244_v52 = vmax.f32 %v239_v50, 0.0 }
 0x191   :  { %v241_v53 = vpop.f32.mrf.mxu0 }
 0x192   :  { %v245_v54 = vpack.c.bf16 %v244_v52, %v244_v52 }
 0x193   :  { %v441_v55 = vpop.f32.mrf.mxu0 }
 0x194   :  { %459 = vmatmul.mubr.bf16.vlgmr.msra.gmra.mxu1 %v245_v54 }
 0x254   :  { %v344_v57 = vpop.f32.mrf.mxu1 }
 0x255   :  { %v357_v58 = vadd.f32 %v402_v56, %v344_v57 }
 0x256   :  { %v460_v59 = vpop.f32.mrf.mxu1 }
 0x257   :  { %359 = vst.msk [vmem:[#allocation10] sm:$0x3] %vm358_vm1, %v357_v58 }
 0x258   :  { %v347_v60 = vpop.f32.mrf.mxu1 }
 0x259   :  { %589 = shalt.err (!%p586_p13)
}
 0x25a   :  { %s590_s6 = scalar_lea.hbm %s366_s13, 32  ;;  %s592_s24 = scalar_lea.hbm %s723_s7, 32 }
 0x25b   :  { %p591_p0 = scmp.ne.s32.totalorder %s366_s13, %s590_s6  ;;  %p594_p1 = scmp.lt.s32.totalorder %s592_s24, %s590_s6 }
 0x25d   :  { %p596_p2 = pnand %p594_p1, %p591_p0 }
 0x25f   :  { %599 = shalt.err (!%p596_p2)
}
 0x260   :  { %371 = dma.vmem_to_hbm [thread:$0]  %s369_s11, 32, %s366_s13, [#allocation4]   ;;  %v461_v61 = vpop.f32.mrf.mxu1 }
 0x261   :  { %606 = dma.done.wait [#allocation4], 32  }
 0x262   :  { %607 = vsyncadd [#allocation4], 4294967264 }
 0x263   :  { %375 = vsyncpa [#allocation3], 1 }
 0x264   :  { %376 = vsyncpa [#allocation6], 1 }
 0x265   :  { %377 = vsyncpa [#allocation9], 1 }
 0x266   :  { %378 = vsyncpa [#allocation4], 1 }

// kernel: tpu_custom_call.1
= control target key start
LH: loop header
LB: loop body
LE: loop exit
PB: predicated region body
PF: predicated region fallthrough
CT: control target
= control target key end

     0   :  { %12 = vsyncpa [#allocation3], 0  ;;  %s689_s0 = inlined_call_operand.hbm [shape: f32[2,4], index: 0, kind: input, shape index: {}]   ;;  %s690_s1 = inlined_call_operand.hbm [shape: f32[4,128], index: 1, kind: input, shape index: {}]   ;;  %s691_s2 = inlined_call_operand.vmem [shape: f32[1,128], index: 2, kind: input, shape index: {}]   ;;  %s692_s3 = inlined_call_operand.hbm [shape: bf16[128,128], index: 3, kind: input, shape index: {}]   ;;  %s693_s4 = inlined_call_operand.vmem [shape: f32[1,128], index: 4, kind: input, shape index: {}]   ;;  %s694_s5 = inlined_call_operand.hbm [shape: bf16[128,128], index: 5, kind: input, shape index: {}]   ;;  %s695_s6 = inlined_call_operand.vmem [shape: f32[1,11], index: 6, kind: input, shape index: {}]   ;;  %s696_s7 = inlined_call_operand.hbm [shape: f32[2,11], index: 7, kind: output, shape index: {}]  }
   0x1   :  { %13 = vsyncpa [#allocation6], 0 }
   0x2   :  { %14 = vsyncpa [#allocation9], 0 }
   0x3   :  { %15 = vsyncpa [#allocation4], 0  ;;  %s594_s24 = smov [#allocation5]   ;;  %s595_s26 = smov [#allocation2]  }
   0x4   :  { %s32_s25 = sshll.u32 %s594_s24, 4  ;;  %s22_s27 = sshll.u32 %s595_s26, 4  ;;  %s33_s25 = int_to_ptr.vmem [resolvable:$true] %s32_s25  ;;  %s23_s27 = int_to_ptr.vmem [resolvable:$true] %s22_s27 }
   0x5   :  { %s494_s28 = scalar_lea.vmem %s33_s25, 64  ;;  %p499_p1 = scmp.lt.s32.totalorder %s33_s25, %s33_s25 }
   0x6   :  { %p495_p0 = scmp.ne.s32.totalorder %s33_s25, %s494_s28  ;;  %p500_p2 = scmp.lt.s32.totalorder %s494_s28, %s494_s28 }
   0x8   :  { %p501_p3 = por %p500_p2, %p499_p1 }
   0xa   :  { %p502_p4 = pnand %p501_p3, %p495_p0 }
   0xc   :  { %505 = shalt.err (!%p502_p4)
}
   0xd   :  { %35 = dma.hbm_to_vmem [thread:$0]  %s690_s1, 64, %s33_s25, [#allocation6]  }
   0xe   :  { %s514_s8 = scalar_lea.vmem %s23_s27, 32  ;;  %p519_p6 = scmp.lt.s32.totalorder %s23_s27, %s23_s27 }
   0xf   :  { %p515_p5 = scmp.ne.s32.totalorder %s23_s27, %s514_s8  ;;  %p520_p7 = scmp.lt.s32.totalorder %s514_s8, %s514_s8 }
  0x11   :  { %p521_p8 = por %p520_p7, %p519_p6 }
  0x13   :  { %p522_p9 = pnand %p521_p8, %p515_p5 }
  0x15   :  { %525 = shalt.err (!%p522_p9)
}
  0x16   :  { %25 = dma.hbm_to_vmem [thread:$0]  %s689_s0, 32, %s23_s27, [#allocation3]  }
  0x17   :  { %s596_s11 = smov [#allocation7]  }
  0x18   :  { %s43_s12 = sshll.u32 %s596_s11, 4  ;;  %s44_s12 = int_to_ptr.vmem [resolvable:$true] %s43_s12 }
  0x19   :  { %s534_s13 = scalar_lea.vmem %s44_s12, 1024  ;;  %p539_p11 = scmp.lt.s32.totalorder %s44_s12, %s44_s12 }
  0x1a   :  { %p535_p10 = scmp.ne.s32.totalorder %s44_s12, %s534_s13  ;;  %p540_p12 = scmp.lt.s32.totalorder %s534_s13, %s534_s13 }
  0x1c   :  { %p541_p13 = por %p540_p12, %p539_p11 }
  0x1e   :  { %p542_p0 = pnand %p541_p13, %p535_p10 }
  0x20   :  { %545 = shalt.err (!%p542_p0)
}
  0x21   :  { %s597_s1 = smov 64   ;;  %s598_s14 = smov 4  }
  0x22   :  { %49 = dma.hbm_to_vmem [thread:$0]  %s692_s3, 1024, %s44_s12, [#allocation6], %s597_s1, %s597_s1, %s598_s14  }
  0x23   :  { %s599_s17 = smov [#allocation8]  }
  0x24   :  { %s57_s18 = sshll.u32 %s599_s17, 4  ;;  %s58_s18 = int_to_ptr.vmem [resolvable:$true] %s57_s18 }
  0x25   :  { %s554_s0 = scalar_lea.vmem %s58_s18, 1024  ;;  %p559_p2 = scmp.lt.s32.totalorder %s58_s18, %s58_s18 }
  0x26   :  { %p555_p1 = scmp.ne.s32.totalorder %s58_s18, %s554_s0  ;;  %p560_p3 = scmp.lt.s32.totalorder %s554_s0, %s554_s0 }
  0x28   :  { %p561_p4 = por %p560_p3, %p559_p2 }
  0x2a   :  { %p562_p5 = pnand %p561_p4, %p555_p1 }
  0x2c   :  { %565 = shalt.err (!%p562_p5)
}
  0x2d   :  { %63 = dma.hbm_to_vmem [thread:$0]  %s694_s5, 1024, %s58_s18, [#allocation9], %s597_s1, %s597_s1, %s598_s14  }
  0x2e   :  { %586 = dma.done.wait [#allocation3], 32  }
  0x2f   :  { %587 = vsyncadd [#allocation3], 4294967264 }
  0x30   :  { %588 = dma.done.wait [#allocation6], 1088  }
  0x31   :  { %589 = vsyncadd [#allocation6], 4294966208 }
  0x32   :  { %590 = dma.done.wait [#allocation9], 1024  }
  0x33   :  { %591 = vsyncadd [#allocation9], 4294966272  ;;  %v600_v0 = vmov 0   ;;  %v601_v1 = vmov 2   ;;  %v602_v2 = vmov 0.0   ;;  %v470_v4 = vld [vmem:[#allocation7 + $0x38] sm:$0xff]   ;;  %v86_v20 = vlaneseq }
  0x34   :  { %465 = vset.pattern.permute.xlu0 %v600_v0  ;;  %467 = vset.pattern.permute.xlu1 %v601_v1  ;;  %v79_v3 = vld [vmem:[#allocation2] sm:$0x3]  ;;  %v471_v5 = vld [vmem:[#allocation7 + $0x30] sm:$0xff]   ;;  %v603_v6 = vmov 1   ;;  %v604_v7 = vmov 3   ;;  %v472_v8 = vld [vmem:[#allocation7 + $0x28] sm:$0xff]  }
  0x35   :  { %412 = vmatprep.subr.bf16.mxu0 %v602_v2  ;;  %432 = vmatprep.subr.bf16.mxu1 %v602_v2  ;;  %v473_v9 = vld [vmem:[#allocation7 + $0x20] sm:$0xff]   ;;  %vm605_vm0 = vmmov 0   ;;  %v474_v10 = vld [vmem:[#allocation7 + $0x18] sm:$0xff]   ;;  %v479_v12 = vld [vmem:[#allocation8 + $0x30] sm:$0xff]   ;;  %v87_v21 = vshrl.u32 %v86_v20, 7  ;;  %s606_s24 = smov [#allocation10]  }
  0x36   :  { %83 = vperm.xlu0 %465, %v79_v3   ;;  %102 = vperm.xlu1 %467, %v79_v3   ;;  %v478_v11 = vld [vmem:[#allocation8 + $0x38] sm:$0xff]   ;;  %v475_v13 = vld [vmem:[#allocation7 + $0x10] sm:$0xff]   ;;  %v480_v14 = vld [vmem:[#allocation8 + $0x28] sm:$0xff]   ;;  %s364_s25 = sshll.u32 %s606_s24, 4  ;;  %vm356_vm1 = vcmask 82944   ;;  %s365_s25 = int_to_ptr.vmem [resolvable:$true] %s364_s25 }
  0x37   :  { %413 = vmatpush3.bf16.msra.mxu0 %v470_v4  ;;  %428 = vmatprep.mubr.msk.bf16.mxu0 %vm605_vm0, %v602_v2  ;;  %v476_v15 = vld [vmem:[#allocation7 + $0x8] sm:$0xff]   ;;  %v481_v16 = vld [vmem:[#allocation8 + $0x20] sm:$0xff]   ;;  %v482_v18 = vld [vmem:[#allocation8 + $0x18] sm:$0xff]   ;;  %v88_v22 = vsub.s32 0, %v87_v21  ;;  %v97_v23 = vsub.s32 1, %v87_v21  ;;  %v107_v26 = vsub.s32 2, %v87_v21  ;;  %p571_p7 = scmp.lt.s32.totalorder %s365_s25, %s365_s25 }
  0x38   :  { %414 = vmatprep.subr.bf16.mxu0 %v602_v2  ;;  %448 = vmatprep.mubr.msk.bf16.mxu1 %vm605_vm0, %v602_v2  ;;  %v477_v17 = vld [vmem:[#allocation7] sm:$0xff]   ;;  %v483_v19 = vld [vmem:[#allocation8 + $0x10] sm:$0xff]   ;;  %v80_v24 = vld [vmem:[#allocation5] sm:$0xf]  ;;  %v117_v28 = vsub.s32 3, %v87_v21 }
  0x39   :  { %433 = vmatpush3.bf16.msra.mxu1 %v478_v11  ;;  %v89_v29 = vrot.slane %v80_v24, %v88_v22  ;;  %v98_v30 = vrot.slane %v80_v24, %v97_v23  ;;  %v108_v31 = vrot.slane %v80_v24, %v107_v26  ;;  %v375_v41 = vld [vmem:[%s691_s2] ss:$0 sm:$0xff]  ;;  %v484_v46 = vld [vmem:[#allocation8 + $0x8] sm:$0xff]   ;;  %v485_v47 = vld [vmem:[#allocation8] sm:$0xff]  }
  0x3a   :  { %466 = vset.pattern.permute.xlu0 %v603_v6  ;;  %468 = vset.pattern.permute.xlu1 %v604_v7  ;;  %v118_v32 = vrot.slane %v80_v24, %v117_v28  ;;  %v376_v48 = vld [vmem:[%s693_s4] ss:$0 sm:$0xff]  ;;  %s566_s4 = scalar_lea.vmem %s365_s25, 32 }
  0x3b   :  { %92 = vperm.xlu0 %466, %v79_v3   ;;  %112 = vperm.xlu1 %468, %v79_v3   ;;  %v393_v56 = vld [vmem:[%s695_s6] ss:$0 sm:$0xff]  ;;  %p567_p6 = scmp.ne.s32.totalorder %s365_s25, %s566_s4  ;;  %p572_p8 = scmp.lt.s32.totalorder %s566_s4, %s566_s4 }
  0x3c   :  { %415 = vmatpush3.bf16.msra.mxu0 %v471_v5  ;;  %434 = vmatprep.subr.bf16.mxu1 %v602_v2 }
  0x3d   :  { %416 = vmatprep.subr.bf16.mxu0 %v602_v2  ;;  %435 = vmatpush3.bf16.msra.mxu1 %v479_v12  ;;  %p573_p9 = por %p572_p8, %p571_p7 }
  0x3e   :  { %436 = vmatprep.subr.bf16.mxu1 %v602_v2 }
  0x3f   :  { %469 = vset.pattern.permute.xlu0 %v604_v7  ;;  %p574_p10 = pnand %p573_p9, %p567_p6 }
  0x40   :  { %417 = vmatpush3.bf16.msra.mxu0 %v472_v8 }
  0x41   :  { %418 = vmatprep.subr.bf16.mxu0 %v602_v2  ;;  %437 = vmatpush3.bf16.msra.mxu1 %v480_v14 }
  0x42   :  { %438 = vmatprep.subr.bf16.mxu1 %v602_v2 }
  0x44   :  { %419 = vmatpush3.bf16.msra.mxu0 %v473_v9 }
  0x45   :  { %420 = vmatprep.subr.bf16.mxu0 %v602_v2  ;;  %439 = vmatpush3.bf16.msra.mxu1 %v481_v16 }
  0x46   :  { %440 = vmatprep.subr.bf16.mxu1 %v602_v2 }
  0x48   :  { %421 = vmatpush3.bf16.msra.mxu0 %v474_v10 }
  0x49   :  { %422 = vmatprep.subr.bf16.mxu0 %v602_v2  ;;  %441 = vmatpush3.bf16.msra.mxu1 %v482_v18 }
  0x4a   :  { %442 = vmatprep.subr.bf16.mxu1 %v602_v2 }
  0x4c   :  { %423 = vmatpush3.bf16.msra.mxu0 %v475_v13 }
  0x4d   :  { %424 = vmatprep.subr.bf16.mxu0 %v602_v2  ;;  %443 = vmatpush3.bf16.msra.mxu1 %v483_v19 }
  0x4e   :  { %444 = vmatprep.subr.bf16.mxu1 %v602_v2 }
  0x50   :  { %425 = vmatpush3.bf16.msra.mxu0 %v476_v15 }
  0x51   :  { %426 = vmatprep.subr.bf16.mxu0 %v602_v2  ;;  %445 = vmatpush3.bf16.msra.mxu1 %v484_v46 }
  0x52   :  { %446 = vmatprep.subr.bf16.mxu1 %v602_v2 }
  0x54   :  { %427 = vmatpush3.bf16.msra.mxu0 %v477_v17 }
  0x55   :  { %447 = vmatpush3.bf16.msra.mxu1 %v485_v47 }
  0xb1   :  { %v84_v25 = vpop.permute.xlu0 %83  ;;  %v103_v27 = vpop.permute.xlu1 %102 }
  0xb2   :  { %v90_v35 = vmul.f32 %v89_v29, %v84_v25  ;;  %v109_v37 = vmul.f32 %v108_v31, %v103_v27 }
  0xb6   :  { %v93_v33 = vpop.permute.xlu0 %92  ;;  %v113_v34 = vpop.permute.xlu1 %112 }
  0xb7   :  { %v99_v36 = vmul.f32 %v98_v30, %v93_v33  ;;  %v119_v39 = vmul.f32 %v118_v32, %v113_v34 }
  0xb9   :  { %v100_v38 = vadd.f32 %v99_v36, %v90_v35 }
  0xbb   :  { %v110_v40 = vadd.f32 %v109_v37, %v100_v38 }
  0xbd   :  { %v120_v42 = vadd.f32 %v119_v39, %v110_v40 }
  0xbf   :  { %v128_v43 = vadd.f32 %v375_v41, %v120_v42 }
  0xc1   :  { %v129_v44 = vmax.f32 %v128_v43, 0.0 }
  0xc3   :  { %v130_v45 = vpack.c.bf16 %v129_v44, %v129_v44 }
  0xc5   :  { %429 = vmatmul.mubr.bf16.vlgmr.msra.gmra.mxu0 %v130_v45 }
 0x185   :  { %v236_v49 = vpop.f32.mrf.mxu0 }
 0x186   :  { %v237_v50 = vadd.f32 %v376_v48, %v236_v49 }
 0x187   :  { %v430_v51 = vpop.f32.mrf.mxu0 }
 0x188   :  { %v242_v52 = vmax.f32 %v237_v50, 0.0 }
 0x189   :  { %v239_v53 = vpop.f32.mrf.mxu0 }
 0x18a   :  { %v243_v54 = vpack.c.bf16 %v242_v52, %v242_v52 }
 0x18b   :  { %v431_v55 = vpop.f32.mrf.mxu0 }
 0x18c   :  { %449 = vmatmul.mubr.bf16.vlgmr.msra.gmra.mxu1 %v243_v54 }
 0x24c   :  { %v342_v57 = vpop.f32.mrf.mxu1 }
 0x24d   :  { %v355_v58 = vadd.f32 %v393_v56, %v342_v57 }
 0x24e   :  { %v450_v59 = vpop.f32.mrf.mxu1 }
 0x24f   :  { %357 = vst.msk [vmem:[#allocation10] sm:$0x3] %vm356_vm1, %v355_v58 }
 0x250   :  { %v345_v60 = vpop.f32.mrf.mxu1 }
 0x251   :  { %577 = shalt.err (!%p574_p10)
}
 0x252   :  { %367 = dma.vmem_to_hbm [thread:$0]  %s365_s25, 32, %s696_s7, [#allocation4]   ;;  %v451_v61 = vpop.f32.mrf.mxu1 }
 0x253   :  { %592 = dma.done.wait [#allocation4], 32  }
 0x254   :  { %593 = vsyncadd [#allocation4], 4294967264 }
 0x255   :  { %371 = vsyncpa [#allocation3], 1 }
 0x256   :  { %372 = vsyncpa [#allocation6], 1 }
 0x257   :  { %373 = vsyncpa [#allocation9], 1 }
 0x258   :  { %374 = vsyncpa [#allocation4], 1 }

// kernel: tpu_custom_call.1
= control target key start
LH: loop header
LB: loop body
LE: loop exit
PB: predicated region body
PF: predicated region fallthrough
CT: control target
= control target key end

     0   :  { %12 = vsyncpa [#allocation3], 0  ;;  %s689_s0 = inlined_call_operand.hbm [shape: f32[2,4], index: 0, kind: input, shape index: {}]   ;;  %s690_s1 = inlined_call_operand.hbm [shape: f32[4,128], index: 1, kind: input, shape index: {}]   ;;  %s691_s2 = inlined_call_operand.vmem [shape: f32[1,128], index: 2, kind: input, shape index: {}]   ;;  %s692_s3 = inlined_call_operand.hbm [shape: bf16[128,128], index: 3, kind: input, shape index: {}]   ;;  %s693_s4 = inlined_call_operand.vmem [shape: f32[1,128], index: 4, kind: input, shape index: {}]   ;;  %s694_s5 = inlined_call_operand.hbm [shape: bf16[128,128], index: 5, kind: input, shape index: {}]   ;;  %s695_s6 = inlined_call_operand.vmem [shape: f32[1,11], index: 6, kind: input, shape index: {}]   ;;  %s696_s7 = inlined_call_operand.hbm [shape: f32[2,11], index: 7, kind: output, shape index: {}]  }
   0x1   :  { %13 = vsyncpa [#allocation6], 0 }
   0x2   :  { %14 = vsyncpa [#allocation9], 0 }
   0x3   :  { %15 = vsyncpa [#allocation4], 0  ;;  %s594_s24 = smov [#allocation5]   ;;  %s595_s26 = smov [#allocation2]  }
   0x4   :  { %s32_s25 = sshll.u32 %s594_s24, 4  ;;  %s22_s27 = sshll.u32 %s595_s26, 4  ;;  %s33_s25 = int_to_ptr.vmem [resolvable:$true] %s32_s25  ;;  %s23_s27 = int_to_ptr.vmem [resolvable:$true] %s22_s27 }
   0x5   :  { %s494_s28 = scalar_lea.vmem %s33_s25, 64  ;;  %p499_p1 = scmp.lt.s32.totalorder %s33_s25, %s33_s25 }
   0x6   :  { %p495_p0 = scmp.ne.s32.totalorder %s33_s25, %s494_s28  ;;  %p500_p2 = scmp.lt.s32.totalorder %s494_s28, %s494_s28 }
   0x8   :  { %p501_p3 = por %p500_p2, %p499_p1 }
   0xa   :  { %p502_p4 = pnand %p501_p3, %p495_p0 }
   0xc   :  { %505 = shalt.err (!%p502_p4)
}
   0xd   :  { %35 = dma.hbm_to_vmem [thread:$0]  %s690_s1, 64, %s33_s25, [#allocation6]  }
   0xe   :  { %s514_s8 = scalar_lea.vmem %s23_s27, 32  ;;  %p519_p6 = scmp.lt.s32.totalorder %s23_s27, %s23_s27 }
   0xf   :  { %p515_p5 = scmp.ne.s32.totalorder %s23_s27, %s514_s8  ;;  %p520_p7 = scmp.lt.s32.totalorder %s514_s8, %s514_s8 }
  0x11   :  { %p521_p8 = por %p520_p7, %p519_p6 }
  0x13   :  { %p522_p9 = pnand %p521_p8, %p515_p5 }
  0x15   :  { %525 = shalt.err (!%p522_p9)
}
  0x16   :  { %25 = dma.hbm_to_vmem [thread:$0]  %s689_s0, 32, %s23_s27, [#allocation3]  }
  0x17   :  { %s596_s11 = smov [#allocation7]  }
  0x18   :  { %s43_s12 = sshll.u32 %s596_s11, 4  ;;  %s44_s12 = int_to_ptr.vmem [resolvable:$true] %s43_s12 }
  0x19   :  { %s534_s13 = scalar_lea.vmem %s44_s12, 1024  ;;  %p539_p11 = scmp.lt.s32.totalorder %s44_s12, %s44_s12 }
  0x1a   :  { %p535_p10 = scmp.ne.s32.totalorder %s44_s12, %s534_s13  ;;  %p540_p12 = scmp.lt.s32.totalorder %s534_s13, %s534_s13 }
  0x1c   :  { %p541_p13 = por %p540_p12, %p539_p11 }
  0x1e   :  { %p542_p0 = pnand %p541_p13, %p535_p10 }
  0x20   :  { %545 = shalt.err (!%p542_p0)
}
  0x21   :  { %s597_s1 = smov 64   ;;  %s598_s14 = smov 4  }
  0x22   :  { %49 = dma.hbm_to_vmem [thread:$0]  %s692_s3, 1024, %s44_s12, [#allocation6], %s597_s1, %s597_s1, %s598_s14  }
  0x23   :  { %s599_s17 = smov [#allocation8]  }
  0x24   :  { %s57_s18 = sshll.u32 %s599_s17, 4  ;;  %s58_s18 = int_to_ptr.vmem [resolvable:$true] %s57_s18 }
  0x25   :  { %s554_s0 = scalar_lea.vmem %s58_s18, 1024  ;;  %p559_p2 = scmp.lt.s32.totalorder %s58_s18, %s58_s18 }
  0x26   :  { %p555_p1 = scmp.ne.s32.totalorder %s58_s18, %s554_s0  ;;  %p560_p3 = scmp.lt.s32.totalorder %s554_s0, %s554_s0 }
  0x28   :  { %p561_p4 = por %p560_p3, %p559_p2 }
  0x2a   :  { %p562_p5 = pnand %p561_p4, %p555_p1 }
  0x2c   :  { %565 = shalt.err (!%p562_p5)
}
  0x2d   :  { %63 = dma.hbm_to_vmem [thread:$0]  %s694_s5, 1024, %s58_s18, [#allocation9], %s597_s1, %s597_s1, %s598_s14  }
  0x2e   :  { %586 = dma.done.wait [#allocation3], 32  }
  0x2f   :  { %587 = vsyncadd [#allocation3], 4294967264 }
  0x30   :  { %588 = dma.done.wait [#allocation6], 1088  }
  0x31   :  { %589 = vsyncadd [#allocation6], 4294966208 }
  0x32   :  { %590 = dma.done.wait [#allocation9], 1024  }
  0x33   :  { %591 = vsyncadd [#allocation9], 4294966272  ;;  %v600_v0 = vmov 0   ;;  %v601_v1 = vmov 2   ;;  %v602_v2 = vmov 0.0   ;;  %v470_v4 = vld [vmem:[#allocation7 + $0x38] sm:$0xff]   ;;  %v86_v20 = vlaneseq }
  0x34   :  { %465 = vset.pattern.permute.xlu0 %v600_v0  ;;  %467 = vset.pattern.permute.xlu1 %v601_v1  ;;  %v79_v3 = vld [vmem:[#allocation2] sm:$0x3]  ;;  %v471_v5 = vld [vmem:[#allocation7 + $0x30] sm:$0xff]   ;;  %v603_v6 = vmov 1   ;;  %v604_v7 = vmov 3   ;;  %v472_v8 = vld [vmem:[#allocation7 + $0x28] sm:$0xff]  }
  0x35   :  { %412 = vmatprep.subr.bf16.mxu0 %v602_v2  ;;  %432 = vmatprep.subr.bf16.mxu1 %v602_v2  ;;  %v473_v9 = vld [vmem:[#allocation7 + $0x20] sm:$0xff]   ;;  %vm605_vm0 = vmmov 0   ;;  %v474_v10 = vld [vmem:[#allocation7 + $0x18] sm:$0xff]   ;;  %v479_v12 = vld [vmem:[#allocation8 + $0x30] sm:$0xff]   ;;  %v87_v21 = vshrl.u32 %v86_v20, 7  ;;  %s606_s24 = smov [#allocation10]  }
  0x36   :  { %83 = vperm.xlu0 %465, %v79_v3   ;;  %102 = vperm.xlu1 %467, %v79_v3   ;;  %v478_v11 = vld [vmem:[#allocation8 + $0x38] sm:$0xff]   ;;  %v475_v13 = vld [vmem:[#allocation7 + $0x10] sm:$0xff]   ;;  %v480_v14 = vld [vmem:[#allocation8 + $0x28] sm:$0xff]   ;;  %s364_s25 = sshll.u32 %s606_s24, 4  ;;  %vm356_vm1 = vcmask 82944   ;;  %s365_s25 = int_to_ptr.vmem [resolvable:$true] %s364_s25 }
  0x37   :  { %413 = vmatpush3.bf16.msra.mxu0 %v470_v4  ;;  %428 = vmatprep.mubr.msk.bf16.mxu0 %vm605_vm0, %v602_v2  ;;  %v476_v15 = vld [vmem:[#allocation7 + $0x8] sm:$0xff]   ;;  %v481_v16 = vld [vmem:[#allocation8 + $0x20] sm:$0xff]   ;;  %v482_v18 = vld [vmem:[#allocation8 + $0x18] sm:$0xff]   ;;  %v88_v22 = vsub.s32 0, %v87_v21  ;;  %v97_v23 = vsub.s32 1, %v87_v21  ;;  %v107_v26 = vsub.s32 2, %v87_v21  ;;  %p571_p7 = scmp.lt.s32.totalorder %s365_s25, %s365_s25 }
  0x38   :  { %414 = vmatprep.subr.bf16.mxu0 %v602_v2  ;;  %448 = vmatprep.mubr.msk.bf16.mxu1 %vm605_vm0, %v602_v2  ;;  %v477_v17 = vld [vmem:[#allocation7] sm:$0xff]   ;;  %v483_v19 = vld [vmem:[#allocation8 + $0x10] sm:$0xff]   ;;  %v80_v24 = vld [vmem:[#allocation5] sm:$0xf]  ;;  %v117_v28 = vsub.s32 3, %v87_v21 }
  0x39   :  { %433 = vmatpush3.bf16.msra.mxu1 %v478_v11  ;;  %v89_v29 = vrot.slane %v80_v24, %v88_v22  ;;  %v98_v30 = vrot.slane %v80_v24, %v97_v23  ;;  %v108_v31 = vrot.slane %v80_v24, %v107_v26  ;;  %v375_v41 = vld [vmem:[%s691_s2] ss:$0 sm:$0xff]  ;;  %v484_v46 = vld [vmem:[#allocation8 + $0x8] sm:$0xff]   ;;  %v485_v47 = vld [vmem:[#allocation8] sm:$0xff]  }
  0x3a   :  { %466 = vset.pattern.permute.xlu0 %v603_v6  ;;  %468 = vset.pattern.permute.xlu1 %v604_v7  ;;  %v118_v32 = vrot.slane %v80_v24, %v117_v28  ;;  %v376_v48 = vld [vmem:[%s693_s4] ss:$0 sm:$0xff]  ;;  %s566_s4 = scalar_lea.vmem %s365_s25, 32 }
  0x3b   :  { %92 = vperm.xlu0 %466, %v79_v3   ;;  %112 = vperm.xlu1 %468, %v79_v3   ;;  %v393_v56 = vld [vmem:[%s695_s6] ss:$0 sm:$0xff]  ;;  %p567_p6 = scmp.ne.s32.totalorder %s365_s25, %s566_s4  ;;  %p572_p8 = scmp.lt.s32.totalorder %s566_s4, %s566_s4 }
  0x3c   :  { %415 = vmatpush3.bf16.msra.mxu0 %v471_v5  ;;  %434 = vmatprep.subr.bf16.mxu1 %v602_v2 }
  0x3d   :  { %416 = vmatprep.subr.bf16.mxu0 %v602_v2  ;;  %435 = vmatpush3.bf16.msra.mxu1 %v479_v12  ;;  %p573_p9 = por %p572_p8, %p571_p7 }
  0x3e   :  { %436 = vmatprep.subr.bf16.mxu1 %v602_v2 }
  0x3f   :  { %469 = vset.pattern.permute.xlu0 %v604_v7  ;;  %p574_p10 = pnand %p573_p9, %p567_p6 }
  0x40   :  { %417 = vmatpush3.bf16.msra.mxu0 %v472_v8 }
  0x41   :  { %418 = vmatprep.subr.bf16.mxu0 %v602_v2  ;;  %437 = vmatpush3.bf16.msra.mxu1 %v480_v14 }
  0x42   :  { %438 = vmatprep.subr.bf16.mxu1 %v602_v2 }
  0x44   :  { %419 = vmatpush3.bf16.msra.mxu0 %v473_v9 }
  0x45   :  { %420 = vmatprep.subr.bf16.mxu0 %v602_v2  ;;  %439 = vmatpush3.bf16.msra.mxu1 %v481_v16 }
  0x46   :  { %440 = vmatprep.subr.bf16.mxu1 %v602_v2 }
  0x48   :  { %421 = vmatpush3.bf16.msra.mxu0 %v474_v10 }
  0x49   :  { %422 = vmatprep.subr.bf16.mxu0 %v602_v2  ;;  %441 = vmatpush3.bf16.msra.mxu1 %v482_v18 }
  0x4a   :  { %442 = vmatprep.subr.bf16.mxu1 %v602_v2 }
  0x4c   :  { %423 = vmatpush3.bf16.msra.mxu0 %v475_v13 }
  0x4d   :  { %424 = vmatprep.subr.bf16.mxu0 %v602_v2  ;;  %443 = vmatpush3.bf16.msra.mxu1 %v483_v19 }
  0x4e   :  { %444 = vmatprep.subr.bf16.mxu1 %v602_v2 }
  0x50   :  { %425 = vmatpush3.bf16.msra.mxu0 %v476_v15 }
  0x51   :  { %426 = vmatprep.subr.bf16.mxu0 %v602_v2  ;;  %445 = vmatpush3.bf16.msra.mxu1 %v484_v46 }
  0x52   :  { %446 = vmatprep.subr.bf16.mxu1 %v602_v2 }
  0x54   :  { %427 = vmatpush3.bf16.msra.mxu0 %v477_v17 }
  0x55   :  { %447 = vmatpush3.bf16.msra.mxu1 %v485_v47 }
  0xb1   :  { %v84_v25 = vpop.permute.xlu0 %83  ;;  %v103_v27 = vpop.permute.xlu1 %102 }
  0xb2   :  { %v90_v35 = vmul.f32 %v89_v29, %v84_v25  ;;  %v109_v37 = vmul.f32 %v108_v31, %v103_v27 }
  0xb6   :  { %v93_v33 = vpop.permute.xlu0 %92  ;;  %v113_v34 = vpop.permute.xlu1 %112 }
  0xb7   :  { %v99_v36 = vmul.f32 %v98_v30, %v93_v33  ;;  %v119_v39 = vmul.f32 %v118_v32, %v113_v34 }
  0xb9   :  { %v100_v38 = vadd.f32 %v99_v36, %v90_v35 }
  0xbb   :  { %v110_v40 = vadd.f32 %v109_v37, %v100_v38 }
  0xbd   :  { %v120_v42 = vadd.f32 %v119_v39, %v110_v40 }
  0xbf   :  { %v128_v43 = vadd.f32 %v375_v41, %v120_v42 }
  0xc1   :  { %v129_v44 = vmax.f32 %v128_v43, 0.0 }
  0xc3   :  { %v130_v45 = vpack.c.bf16 %v129_v44, %v129_v44 }
  0xc5   :  { %429 = vmatmul.mubr.bf16.vlgmr.msra.gmra.mxu0 %v130_v45 }
 0x185   :  { %v236_v49 = vpop.f32.mrf.mxu0 }
 0x186   :  { %v237_v50 = vadd.f32 %v376_v48, %v236_v49 }
 0x187   :  { %v430_v51 = vpop.f32.mrf.mxu0 }
 0x188   :  { %v242_v52 = vmax.f32 %v237_v50, 0.0 }
 0x189   :  { %v239_v53 = vpop.f32.mrf.mxu0 }
 0x18a   :  { %v243_v54 = vpack.c.bf16 %v242_v52, %v242_v52 }
 0x18b   :  { %v431_v55 = vpop.f32.mrf.mxu0 }
 0x18c   :  { %449 = vmatmul.mubr.bf16.vlgmr.msra.gmra.mxu1 %v243_v54 }
 0x24c   :  { %v342_v57 = vpop.f32.mrf.mxu1 }
 0x24d   :  { %v355_v58 = vadd.f32 %v393_v56, %v342_v57 }
 0x24e   :  { %v450_v59 = vpop.f32.mrf.mxu1 }
 0x24f   :  { %357 = vst.msk [vmem:[#allocation10] sm:$0x3] %vm356_vm1, %v355_v58 }
 0x250   :  { %v345_v60 = vpop.f32.mrf.mxu1 }
 0x251   :  { %577 = shalt.err (!%p574_p10)
}
 0x252   :  { %367 = dma.vmem_to_hbm [thread:$0]  %s365_s25, 32, %s696_s7, [#allocation4]   ;;  %v451_v61 = vpop.f32.mrf.mxu1 }
 0x253   :  { %592 = dma.done.wait [#allocation4], 32  }
 0x254   :  { %593 = vsyncadd [#allocation4], 4294967264 }
 0x255   :  { %371 = vsyncpa [#allocation3], 1 }
 0x256   :  { %372 = vsyncpa [#allocation6], 1 }
 0x257   :  { %373 = vsyncpa [#allocation9], 1 }
 0x258   :  { %374 = vsyncpa [#allocation4], 1 }

</bundles_post_ra>
